<compile_context>
chip_gen: v7x
topology: tpu7x:2x2x1
jax: 0.10.0
libtpu: 0.0.40
codegen_flags: <defaults>
</compile_context>

<pallas_src>
import jax
import jax.numpy as jnp
from jax.experimental import pallas as pl
from jax.experimental.pallas import tpu as pltpu


# --------------------------- recurrent kernel -------------------------------
def _make_gru_kernel(num_chains, Tc, reverses):
    """Fused multi-chain (e.g. fwd+bwd) GRU recurrence over chunks of Tc steps.

    Ref order: gi[0..n), h0[0..n), W_hh^T[0..n), b_hh[0..n),
               y[0..n), h_n[0..n), h_scratch[0..n).
    gi = x @ W_ih^T + b_ih is precomputed outside the kernel (no serial dep).
    """
    def kernel(*refs):
        n = num_chains
        gi_refs = refs[0 * n:1 * n]      # (Tc, B, 3H) each
        h0_refs = refs[1 * n:2 * n]      # (B, H)
        wh_refs = refs[2 * n:3 * n]      # (H, 3H)
        bh_refs = refs[3 * n:4 * n]      # (1, 3H)
        y_refs = refs[4 * n:5 * n]       # (Tc, B, H)
        hn_refs = refs[5 * n:6 * n]      # (B, H)
        h_scrs = refs[6 * n:7 * n]       # (B, H) f32 scratch

        c = pl.program_id(0)

        @pl.when(c == 0)
        def _():
            for d in range(n):
                h_scrs[d][...] = h0_refs[d][...].astype(jnp.float32)

        hs = [h_scrs[d][...] for d in range(n)]
        whs = [wh_refs[d][...] for d in range(n)]      # hoisted loads
        bhs = [bh_refs[d][...] for d in range(n)]
        H = hs[0].shape[-1]

        # Fully unrolled chunk of Tc steps; independent chains interleaved.
        for i in range(Tc):
            for d in range(n):
                ii = (Tc - 1 - i) if reverses[d] else i
                gi = gi_refs[d][ii].astype(jnp.float32)            # (B, 3H)
                gh = jnp.dot(hs[d], whs[d],
                             preferred_element_type=jnp.float32) + bhs[d]
                r = jax.nn.sigmoid(gi[:, 0 * H:1 * H] + gh[:, 0 * H:1 * H])
                z = jax.nn.sigmoid(gi[:, 1 * H:2 * H] + gh[:, 1 * H:2 * H])
                ng = jnp.tanh(gi[:, 2 * H:3 * H] + r * gh[:, 2 * H:3 * H])
                hs[d] = (1.0 - z) * ng + z * hs[d]
                y_refs[d][ii] = hs[d].astype(y_refs[d].dtype)

        for d in range(n):
            h_scrs[d][...] = hs[d]                     # carry across chunks

        @pl.when(c == pl.num_programs(0) - 1)          # gated final-h write
        def _():
            for d in range(n):
                hn_refs[d][...] = hs[d].astype(hn_refs[d].dtype)

    return kernel


def _pick_chunk(T, cap=32):
    """Largest divisor of T that is <= cap (chunk of timesteps per grid step)."""
    tc = min(T, cap)
    while T % tc != 0:
        tc -= 1
    return max(tc, 1)


def _time_map(reverse, nc):
    if reverse:
        return lambda c: (nc - 1 - c, 0, 0)
    return lambda c: (c, 0, 0)


def gru_layer(x, chains):
    """One GRU layer; `chains` = list of dicts (1 for uni-, 2 for bidirectional).

    x: (T, B, I).  Each chain: w_ih (3H, I), w_hh (3H, H), b_ih/b_hh (3H,),
    h0 (B, H), reverse (bool).  Returns ([y_d], [hn_d]).
    """
    T, B, I = x.shape
    H = chains[0]["h0"].shape[-1]
    n = len(chains)
    Tc = _pick_chunk(T)
    nc = T // Tc

    # Hoisted input projection: one (T*B, I) x (I, 3H) matmul per chain.
    x2 = x.reshape(T * B, I).astype(jnp.float32)
    gi_list, h0_list, wh_list, bh_list, reverses = [], [], [], [], []
    for ch in chains:
        gi = (jnp.dot(x2, jnp.transpose(ch["w_ih"]),
                      preferred_element_type=jnp.float32)
              + ch["b_ih"]).reshape(T, B, 3 * H)
        gi_list.append(gi)
        h0_list.append(ch["h0"])
        wh_list.append(jnp.transpose(ch["w_hh"]))      # (H, 3H)
        bh_list.append(ch["b_hh"].reshape(1, 3 * H))
        reverses.append(bool(ch["reverse"]))

    const_map = lambda c: (0, 0)
    in_specs = (
        [pl.BlockSpec((Tc, B, 3 * H), _time_map(r, nc)) for r in reverses]
        + [pl.BlockSpec((B, H), const_map)] * n
        + [pl.BlockSpec((H, 3 * H), const_map)] * n
        + [pl.BlockSpec((1, 3 * H), const_map)] * n
    )
    out_specs = (
        [pl.BlockSpec((Tc, B, H), _time_map(r, nc)) for r in reverses]
        + [pl.BlockSpec((B, H), const_map)] * n
    )
    out_shape = ([jax.ShapeDtypeStruct((T, B, H), x.dtype)] * n
                 + [jax.ShapeDtypeStruct((B, H), x.dtype)] * n)

    kernel = _make_gru_kernel(n, Tc, tuple(reverses))

    outs = pl.pallas_call(
        kernel,
        out_shape=out_shape,
        grid_spec=pltpu.PrefetchScalarGridSpec(
            num_scalar_prefetch=0,
            grid=(nc,),
            in_specs=in_specs,
            out_specs=out_specs,
            scratch_shapes=[pltpu.VMEM((B, H), jnp.float32)] * n),
        compiler_params=pltpu.CompilerParams(
            dimension_semantics=("arbitrary",)),       # sequential recurrence
    )(*gi_list, *h0_list, *wh_list, *bh_list)

    ys = list(outs[:n])
    hns = list(outs[n:])
    return ys, hns


def pallas_gru(x, h0, params, *, num_layers, bidirectional, batch_first):
    """Mirrors torch.nn.GRU forward: returns (output, h_n)."""
    if batch_first:
        x = jnp.transpose(x, (1, 0, 2))
    D = 2 if bidirectional else 1
    layer_in = x
    h_n = []
    for layer in range(num_layers):
        chains = []
        for d in range(D):
            w_ih, w_hh, b_ih, b_hh = params[layer * D + d]
            chains.append(dict(w_ih=w_ih, w_hh=w_hh, b_ih=b_ih, b_hh=b_hh,
                               h0=h0[layer * D + d], reverse=(d == 1)))
        ys, hns = gru_layer(layer_in, chains)
        h_n.extend(hns)
        layer_in = jnp.concatenate(ys, axis=-1) if D == 2 else ys[0]
    out = layer_in
    if batch_first:
        out = jnp.transpose(out, (1, 0, 2))
    return out, jnp.stack(h_n, axis=0)


# ---------------- pure-JAX reference (for correctness check) ----------------
def _gru_cell_ref(h, x_t, w_ih, w_hh, b_ih, b_hh):
    H = h.shape[-1]
    gi = x_t @ w_ih.T + b_ih
    gh = h @ w_hh.T + b_hh
    r = jax.nn.sigmoid(gi[:, :H] + gh[:, :H])
    z = jax.nn.sigmoid(gi[:, H:2 * H] + gh[:, H:2 * H])
    n = jnp.tanh(gi[:, 2 * H:] + r * gh[:, 2 * H:])
    h_new = (1.0 - z) * n + z * h
    return h_new, h_new


def ref_gru(x, h0, params, *, num_layers, bidirectional, batch_first):
    if batch_first:
        x = jnp.transpose(x, (1, 0, 2))
    D = 2 if bidirectional else 1
    layer_in = x
    h_n = []
    for layer in range(num_layers):
        outs = []
        for d in range(D):
            w_ih, w_hh, b_ih, b_hh = params[layer * D + d]
            xi = layer_in if d == 0 else jnp.flip(layer_in, axis=0)
            hn, y = jax.lax.scan(
                lambda h, xt: _gru_cell_ref(h, xt, w_ih, w_hh, b_ih, b_hh),
                h0[layer * D + d], xi)
            if d == 1:
                y = jnp.flip(y, axis=0)
            outs.append(y)
            h_n.append(hn)
        layer_in = jnp.concatenate(outs, axis=-1) if D == 2 else outs[0]
    out = layer_in
    if batch_first:
        out = jnp.transpose(out, (1, 0, 2))
    return out, jnp.stack(h_n, axis=0)


if __name__ == "__main__":
    # Module config (has_bias=True; batch_first=False -> seq-major input).
    INPUT_SIZE = 16
    HIDDEN = 32
    NUM_LAYERS = 2
    BIDIRECTIONAL = True
    BATCH_FIRST = False
    SEQ = 8
    BATCH = 2
    D = 2 if BIDIRECTIONAL else 1

    key = jax.random.PRNGKey(0)
    k_x, k_h, k_p = jax.random.split(key, 3)

    x = jax.random.normal(k_x, (SEQ, BATCH, INPUT_SIZE), dtype=jnp.float32)
    h0 = jax.random.normal(k_h, (NUM_LAYERS * D, BATCH, HIDDEN),
                           dtype=jnp.float32)

    # Deterministic PyTorch-style init: U(-1/sqrt(H), 1/sqrt(H)).
    bound = 1.0 / jnp.sqrt(jnp.float32(HIDDEN))
    params = []
    pkeys = jax.random.split(k_p, NUM_LAYERS * D * 4)
    ki = 0
    for layer in range(NUM_LAYERS):
        in_size = INPUT_SIZE if layer == 0 else D * HIDDEN
        for d in range(D):
            w_ih = jax.random.uniform(pkeys[ki], (3 * HIDDEN, in_size),
                                      minval=-bound, maxval=bound); ki += 1
            w_hh = jax.random.uniform(pkeys[ki], (3 * HIDDEN, HIDDEN),
                                      minval=-bound, maxval=bound); ki += 1
            b_ih = jax.random.uniform(pkeys[ki], (3 * HIDDEN,),
                                      minval=-bound, maxval=bound); ki += 1
            b_hh = jax.random.uniform(pkeys[ki], (3 * HIDDEN,),
                                      minval=-bound, maxval=bound); ki += 1
            params.append((w_ih, w_hh, b_ih, b_hh))

    out, h_n = pallas_gru(x, h0, params, num_layers=NUM_LAYERS,
                          bidirectional=BIDIRECTIONAL,
                          batch_first=BATCH_FIRST)
    out = jax.block_until_ready(out)
    h_n = jax.block_until_ready(h_n)

    out_ref, h_n_ref = ref_gru(x, h0, params, num_layers=NUM_LAYERS,
                               bidirectional=BIDIRECTIONAL,
                               batch_first=BATCH_FIRST)

    assert out.shape == (SEQ, BATCH, D * HIDDEN)
    assert h_n.shape == (NUM_LAYERS * D, BATCH, HIDDEN)
    assert jnp.allclose(out, out_ref, atol=1e-5, rtol=1e-5)
    assert jnp.allclose(h_n, h_n_ref, atol=1e-5, rtol=1e-5)

    print("KERNEL_OK")
</pallas_src>

<mosaic_0001>
module attributes {stable_mosaic.version = 11 : i64} {
  func.func @kernel(%arg0: i32, %arg1: memref<8x2x96xf32, #tpu.memory_space<vmem>>, %arg2: memref<8x2x96xf32, #tpu.memory_space<vmem>>, %arg3: memref<2x32xf32, #tpu.memory_space<vmem>>, %arg4: memref<2x32xf32, #tpu.memory_space<vmem>>, %arg5: memref<32x96xf32, #tpu.memory_space<vmem>>, %arg6: memref<32x96xf32, #tpu.memory_space<vmem>>, %arg7: memref<1x96xf32, #tpu.memory_space<vmem>>, %arg8: memref<1x96xf32, #tpu.memory_space<vmem>>, %arg9: memref<8x2x32xf32, #tpu.memory_space<vmem>>, %arg10: memref<8x2x32xf32, #tpu.memory_space<vmem>>, %arg11: memref<2x32xf32, #tpu.memory_space<vmem>>, %arg12: memref<2x32xf32, #tpu.memory_space<vmem>>, %arg13: memref<2x32xf32, #tpu.memory_space<vmem>>, %arg14: memref<2x32xf32, #tpu.memory_space<vmem>>) attributes {dimension_semantics = [#tpu.dimension_semantics<arbitrary>], iteration_bounds = array<i64: 1>, scalar_prefetch = 0 : i64, scratch_operands = 2 : i64, tpu.core_type = #tpu.core_type<tc>, window_params = [{transform_indices = @transform_0, window_bounds = array<i64: 8, 2, 96>}, {transform_indices = @transform_1, window_bounds = array<i64: 8, 2, 96>}, {pipeline_mode = #tpu.pipeline_mode<synchronous>, transform_indices = @transform_2, window_bounds = array<i64: 2, 32>}, {pipeline_mode = #tpu.pipeline_mode<synchronous>, transform_indices = @transform_3, window_bounds = array<i64: 2, 32>}, {pipeline_mode = #tpu.pipeline_mode<synchronous>, transform_indices = @transform_4, window_bounds = array<i64: 32, 96>}, {pipeline_mode = #tpu.pipeline_mode<synchronous>, transform_indices = @transform_5, window_bounds = array<i64: 32, 96>}, {pipeline_mode = #tpu.pipeline_mode<synchronous>, transform_indices = @transform_6, window_bounds = array<i64: 1, 96>}, {pipeline_mode = #tpu.pipeline_mode<synchronous>, transform_indices = @transform_7, window_bounds = array<i64: 1, 96>}, {transform_indices = @transform_8, window_bounds = array<i64: 8, 2, 32>}, {transform_indices = @transform_9, window_bounds = array<i64: 8, 2, 32>}, {pipeline_mode = #tpu.pipeline_mode<synchronous>, transform_indices = @transform_10, window_bounds = array<i64: 2, 32>}, {pipeline_mode = #tpu.pipeline_mode<synchronous>, transform_indices = @transform_11, window_bounds = array<i64: 2, 32>}]} {
    %c0_i32 = arith.constant 0 : i32
    %0 = arith.cmpi eq, %arg0, %c0_i32 : i32
    %1 = arith.extui %0 : i1 to i32
    %c0_i32_0 = arith.constant 0 : i32
    %2 = arith.cmpi ne, %1, %c0_i32_0 : i32
    scf.if %2 {
      %c0_170 = arith.constant 0 : index
      %c0_171 = arith.constant 0 : index
      %558 = vector.load %arg3[%c0_170, %c0_171] : memref<2x32xf32, #tpu.memory_space<vmem>>, vector<2x32xf32>
      %c0_172 = arith.constant 0 : index
      %c0_173 = arith.constant 0 : index
      %559 = vector.load %arg13[%c0_172, %c0_173] : memref<2x32xf32, #tpu.memory_space<vmem>>, vector<2x32xf32>
      tpu.vector_store %arg13[%c0_172, %c0_173], %558 {strides = array<i32>} : memref<2x32xf32, #tpu.memory_space<vmem>>, vector<2x32xf32>,
      %c0_174 = arith.constant 0 : index
      %c0_175 = arith.constant 0 : index
      %560 = vector.load %arg4[%c0_174, %c0_175] : memref<2x32xf32, #tpu.memory_space<vmem>>, vector<2x32xf32>
      %c0_176 = arith.constant 0 : index
      %c0_177 = arith.constant 0 : index
      %561 = vector.load %arg14[%c0_176, %c0_177] : memref<2x32xf32, #tpu.memory_space<vmem>>, vector<2x32xf32>
      tpu.vector_store %arg14[%c0_176, %c0_177], %560 {strides = array<i32>} : memref<2x32xf32, #tpu.memory_space<vmem>>, vector<2x32xf32>,
    } else {
    }
    %c0 = arith.constant 0 : index
    %c0_1 = arith.constant 0 : index
    %3 = vector.load %arg13[%c0, %c0_1] : memref<2x32xf32, #tpu.memory_space<vmem>>, vector<2x32xf32>
    %c0_2 = arith.constant 0 : index
    %c0_3 = arith.constant 0 : index
    %4 = vector.load %arg14[%c0_2, %c0_3] : memref<2x32xf32, #tpu.memory_space<vmem>>, vector<2x32xf32>
    %c0_4 = arith.constant 0 : index
    %c0_5 = arith.constant 0 : index
    %5 = vector.load %arg5[%c0_4, %c0_5] : memref<32x96xf32, #tpu.memory_space<vmem>>, vector<32x96xf32>
    %c0_6 = arith.constant 0 : index
    %c0_7 = arith.constant 0 : index
    %6 = vector.load %arg6[%c0_6, %c0_7] : memref<32x96xf32, #tpu.memory_space<vmem>>, vector<32x96xf32>
    %c0_8 = arith.constant 0 : index
    %c0_9 = arith.constant 0 : index
    %7 = vector.load %arg7[%c0_8, %c0_9] : memref<1x96xf32, #tpu.memory_space<vmem>>, vector<1x96xf32>
    %c0_10 = arith.constant 0 : index
    %c0_11 = arith.constant 0 : index
    %8 = vector.load %arg8[%c0_10, %c0_11] : memref<1x96xf32, #tpu.memory_space<vmem>>, vector<1x96xf32>
    %c0_12 = arith.constant 0 : index
    %c0_13 = arith.constant 0 : index
    %c0_14 = arith.constant 0 : index
    %9 = vector.load %arg1[%c0_12, %c0_13, %c0_14] : memref<8x2x96xf32, #tpu.memory_space<vmem>>, vector<1x2x96xf32>
    %10 = vector.shape_cast %9 : vector<1x2x96xf32> to vector<2x96xf32>
    %cst = arith.constant dense<0.000000e+00> : vector<2x96xf32>
    %11 = tpu.matmul %3, %5, %cst {dimension_numbers = #tpu.dot_dimension_numbers<[1], [0], [0], [1], [0, 0, 1, 1], [], []>} : vector<2x32xf32>, vector<32x96xf32>, vector<2x96xf32> -> vector<2x96xf32>
    %12 = vector.broadcast %7 : vector<1x96xf32> to vector<2x96xf32>
    %13 = arith.addf %11, %12 : vector<2x96xf32>
    %14 = vector.extract_strided_slice %10 {offsets = [0, 0], sizes = [2, 32], strides = [1, 1]} : vector<2x96xf32> to vector<2x32xf32>
    %15 = vector.extract_strided_slice %13 {offsets = [0, 0], sizes = [2, 32], strides = [1, 1]} : vector<2x96xf32> to vector<2x32xf32>
    %16 = arith.addf %14, %15 : vector<2x32xf32>
    %17 = arith.negf %16 : vector<2x32xf32>
    %18 = math.exp %17 : vector<2x32xf32>
    %cst_15 = arith.constant 1.000000e+00 : f32
    %19 = vector.broadcast %cst_15 : f32 to vector<2x32xf32>
    %20 = arith.addf %19, %18 : vector<2x32xf32>
    %21 = arith.divf %19, %20 : vector<2x32xf32>
    %22 = vector.extract_strided_slice %10 {offsets = [0, 32], sizes = [2, 32], strides = [1, 1]} : vector<2x96xf32> to vector<2x32xf32>
    %23 = vector.extract_strided_slice %13 {offsets = [0, 32], sizes = [2, 32], strides = [1, 1]} : vector<2x96xf32> to vector<2x32xf32>
    %24 = arith.addf %22, %23 : vector<2x32xf32>
    %25 = arith.negf %24 : vector<2x32xf32>
    %26 = math.exp %25 : vector<2x32xf32>
    %cst_16 = arith.constant 1.000000e+00 : f32
    %27 = vector.broadcast %cst_16 : f32 to vector<2x32xf32>
    %28 = arith.addf %27, %26 : vector<2x32xf32>
    %29 = arith.divf %27, %28 : vector<2x32xf32>
    %30 = vector.extract_strided_slice %10 {offsets = [0, 64], sizes = [2, 32], strides = [1, 1]} : vector<2x96xf32> to vector<2x32xf32>
    %31 = vector.extract_strided_slice %13 {offsets = [0, 64], sizes = [2, 32], strides = [1, 1]} : vector<2x96xf32> to vector<2x32xf32>
    %32 = arith.mulf %21, %31 : vector<2x32xf32>
    %33 = arith.addf %30, %32 : vector<2x32xf32>
    %34 = math.tanh %33 : vector<2x32xf32>
    %cst_17 = arith.constant 1.000000e+00 : f32
    %35 = vector.broadcast %cst_17 : f32 to vector<2x32xf32>
    %36 = arith.subf %35, %29 : vector<2x32xf32>
    %37 = arith.mulf %36, %34 : vector<2x32xf32>
    %38 = arith.mulf %29, %3 : vector<2x32xf32>
    %39 = arith.addf %37, %38 : vector<2x32xf32>
    %c0_18 = arith.constant 0 : index
    %c0_19 = arith.constant 0 : index
    %c0_20 = arith.constant 0 : index
    %40 = vector.load %arg9[%c0_18, %c0_19, %c0_20] : memref<8x2x32xf32, #tpu.memory_space<vmem>>, vector<1x2x32xf32>
    %41 = vector.shape_cast %40 : vector<1x2x32xf32> to vector<2x32xf32>
    %42 = vector.shape_cast %39 : vector<2x32xf32> to vector<1x2x32xf32>
    tpu.vector_store %arg9[%c0_18, %c0_19, %c0_20], %42 {strides = array<i32>} : memref<8x2x32xf32, #tpu.memory_space<vmem>>, vector<1x2x32xf32>,
    %c7 = arith.constant 7 : index
    %c0_21 = arith.constant 0 : index
    %c0_22 = arith.constant 0 : index
    %43 = vector.load %arg2[%c7, %c0_21, %c0_22] : memref<8x2x96xf32, #tpu.memory_space<vmem>>, vector<1x2x96xf32>
    %44 = vector.shape_cast %43 : vector<1x2x96xf32> to vector<2x96xf32>
    %cst_23 = arith.constant dense<0.000000e+00> : vector<2x96xf32>
    %45 = tpu.matmul %4, %6, %cst_23 {dimension_numbers = #tpu.dot_dimension_numbers<[1], [0], [0], [1], [0, 0, 1, 1], [], []>} : vector<2x32xf32>, vector<32x96xf32>, vector<2x96xf32> -> vector<2x96xf32>
    %46 = vector.broadcast %8 : vector<1x96xf32> to vector<2x96xf32>
    %47 = arith.addf %45, %46 : vector<2x96xf32>
    %48 = vector.extract_strided_slice %44 {offsets = [0, 0], sizes = [2, 32], strides = [1, 1]} : vector<2x96xf32> to vector<2x32xf32>
    %49 = vector.extract_strided_slice %47 {offsets = [0, 0], sizes = [2, 32], strides = [1, 1]} : vector<2x96xf32> to vector<2x32xf32>
    %50 = arith.addf %48, %49 : vector<2x32xf32>
    %51 = arith.negf %50 : vector<2x32xf32>
    %52 = math.exp %51 : vector<2x32xf32>
    %cst_24 = arith.constant 1.000000e+00 : f32
    %53 = vector.broadcast %cst_24 : f32 to vector<2x32xf32>
    %54 = arith.addf %53, %52 : vector<2x32xf32>
    %55 = arith.divf %53, %54 : vector<2x32xf32>
    %56 = vector.extract_strided_slice %44 {offsets = [0, 32], sizes = [2, 32], strides = [1, 1]} : vector<2x96xf32> to vector<2x32xf32>
    %57 = vector.extract_strided_slice %47 {offsets = [0, 32], sizes = [2, 32], strides = [1, 1]} : vector<2x96xf32> to vector<2x32xf32>
    %58 = arith.addf %56, %57 : vector<2x32xf32>
    %59 = arith.negf %58 : vector<2x32xf32>
    %60 = math.exp %59 : vector<2x32xf32>
    %cst_25 = arith.constant 1.000000e+00 : f32
    %61 = vector.broadcast %cst_25 : f32 to vector<2x32xf32>
    %62 = arith.addf %61, %60 : vector<2x32xf32>
    %63 = arith.divf %61, %62 : vector<2x32xf32>
    %64 = vector.extract_strided_slice %44 {offsets = [0, 64], sizes = [2, 32], strides = [1, 1]} : vector<2x96xf32> to vector<2x32xf32>
    %65 = vector.extract_strided_slice %47 {offsets = [0, 64], sizes = [2, 32], strides = [1, 1]} : vector<2x96xf32> to vector<2x32xf32>
    %66 = arith.mulf %55, %65 : vector<2x32xf32>
    %67 = arith.addf %64, %66 : vector<2x32xf32>
    %68 = math.tanh %67 : vector<2x32xf32>
    %cst_26 = arith.constant 1.000000e+00 : f32
    %69 = vector.broadcast %cst_26 : f32 to vector<2x32xf32>
    %70 = arith.subf %69, %63 : vector<2x32xf32>
    %71 = arith.mulf %70, %68 : vector<2x32xf32>
    %72 = arith.mulf %63, %4 : vector<2x32xf32>
    %73 = arith.addf %71, %72 : vector<2x32xf32>
    %c7_27 = arith.constant 7 : index
    %c0_28 = arith.constant 0 : index
    %c0_29 = arith.constant 0 : index
    %74 = vector.load %arg10[%c7_27, %c0_28, %c0_29] : memref<8x2x32xf32, #tpu.memory_space<vmem>>, vector<1x2x32xf32>
    %75 = vector.shape_cast %74 : vector<1x2x32xf32> to vector<2x32xf32>
    %76 = vector.shape_cast %73 : vector<2x32xf32> to vector<1x2x32xf32>
    tpu.vector_store %arg10[%c7_27, %c0_28, %c0_29], %76 {strides = array<i32>} : memref<8x2x32xf32, #tpu.memory_space<vmem>>, vector<1x2x32xf32>,
    %c1 = arith.constant 1 : index
    %c0_30 = arith.constant 0 : index
    %c0_31 = arith.constant 0 : index
    %77 = vector.load %arg1[%c1, %c0_30, %c0_31] : memref<8x2x96xf32, #tpu.memory_space<vmem>>, vector<1x2x96xf32>
    %78 = vector.shape_cast %77 : vector<1x2x96xf32> to vector<2x96xf32>
    %cst_32 = arith.constant dense<0.000000e+00> : vector<2x96xf32>
    %79 = tpu.matmul %39, %5, %cst_32 {dimension_numbers = #tpu.dot_dimension_numbers<[1], [0], [0], [1], [0, 0, 1, 1], [], []>} : vector<2x32xf32>, vector<32x96xf32>, vector<2x96xf32> -> vector<2x96xf32>
    %80 = vector.broadcast %7 : vector<1x96xf32> to vector<2x96xf32>
    %81 = arith.addf %79, %80 : vector<2x96xf32>
    %82 = vector.extract_strided_slice %78 {offsets = [0, 0], sizes = [2, 32], strides = [1, 1]} : vector<2x96xf32> to vector<2x32xf32>
    %83 = vector.extract_strided_slice %81 {offsets = [0, 0], sizes = [2, 32], strides = [1, 1]} : vector<2x96xf32> to vector<2x32xf32>
    %84 = arith.addf %82, %83 : vector<2x32xf32>
    %85 = arith.negf %84 : vector<2x32xf32>
    %86 = math.exp %85 : vector<2x32xf32>
    %cst_33 = arith.constant 1.000000e+00 : f32
    %87 = vector.broadcast %cst_33 : f32 to vector<2x32xf32>
    %88 = arith.addf %87, %86 : vector<2x32xf32>
    %89 = arith.divf %87, %88 : vector<2x32xf32>
    %90 = vector.extract_strided_slice %78 {offsets = [0, 32], sizes = [2, 32], strides = [1, 1]} : vector<2x96xf32> to vector<2x32xf32>
    %91 = vector.extract_strided_slice %81 {offsets = [0, 32], sizes = [2, 32], strides = [1, 1]} : vector<2x96xf32> to vector<2x32xf32>
    %92 = arith.addf %90, %91 : vector<2x32xf32>
    %93 = arith.negf %92 : vector<2x32xf32>
    %94 = math.exp %93 : vector<2x32xf32>
    %cst_34 = arith.constant 1.000000e+00 : f32
    %95 = vector.broadcast %cst_34 : f32 to vector<2x32xf32>
    %96 = arith.addf %95, %94 : vector<2x32xf32>
    %97 = arith.divf %95, %96 : vector<2x32xf32>
    %98 = vector.extract_strided_slice %78 {offsets = [0, 64], sizes = [2, 32], strides = [1, 1]} : vector<2x96xf32> to vector<2x32xf32>
    %99 = vector.extract_strided_slice %81 {offsets = [0, 64], sizes = [2, 32], strides = [1, 1]} : vector<2x96xf32> to vector<2x32xf32>
    %100 = arith.mulf %89, %99 : vector<2x32xf32>
    %101 = arith.addf %98, %100 : vector<2x32xf32>
    %102 = math.tanh %101 : vector<2x32xf32>
    %cst_35 = arith.constant 1.000000e+00 : f32
    %103 = vector.broadcast %cst_35 : f32 to vector<2x32xf32>
    %104 = arith.subf %103, %97 : vector<2x32xf32>
    %105 = arith.mulf %104, %102 : vector<2x32xf32>
    %106 = arith.mulf %97, %39 : vector<2x32xf32>
    %107 = arith.addf %105, %106 : vector<2x32xf32>
    %c1_36 = arith.constant 1 : index
    %c0_37 = arith.constant 0 : index
    %c0_38 = arith.constant 0 : index
    %108 = vector.load %arg9[%c1_36, %c0_37, %c0_38] : memref<8x2x32xf32, #tpu.memory_space<vmem>>, vector<1x2x32xf32>
    %109 = vector.shape_cast %108 : vector<1x2x32xf32> to vector<2x32xf32>
    %110 = vector.shape_cast %107 : vector<2x32xf32> to vector<1x2x32xf32>
    tpu.vector_store %arg9[%c1_36, %c0_37, %c0_38], %110 {strides = array<i32>} : memref<8x2x32xf32, #tpu.memory_space<vmem>>, vector<1x2x32xf32>,
    %c6 = arith.constant 6 : index
    %c0_39 = arith.constant 0 : index
    %c0_40 = arith.constant 0 : index
    %111 = vector.load %arg2[%c6, %c0_39, %c0_40] : memref<8x2x96xf32, #tpu.memory_space<vmem>>, vector<1x2x96xf32>
    %112 = vector.shape_cast %111 : vector<1x2x96xf32> to vector<2x96xf32>
    %cst_41 = arith.constant dense<0.000000e+00> : vector<2x96xf32>
    %113 = tpu.matmul %73, %6, %cst_41 {dimension_numbers = #tpu.dot_dimension_numbers<[1], [0], [0], [1], [0, 0, 1, 1], [], []>} : vector<2x32xf32>, vector<32x96xf32>, vector<2x96xf32> -> vector<2x96xf32>
    %114 = vector.broadcast %8 : vector<1x96xf32> to vector<2x96xf32>
    %115 = arith.addf %113, %114 : vector<2x96xf32>
    %116 = vector.extract_strided_slice %112 {offsets = [0, 0], sizes = [2, 32], strides = [1, 1]} : vector<2x96xf32> to vector<2x32xf32>
    %117 = vector.extract_strided_slice %115 {offsets = [0, 0], sizes = [2, 32], strides = [1, 1]} : vector<2x96xf32> to vector<2x32xf32>
    %118 = arith.addf %116, %117 : vector<2x32xf32>
    %119 = arith.negf %118 : vector<2x32xf32>
    %120 = math.exp %119 : vector<2x32xf32>
    %cst_42 = arith.constant 1.000000e+00 : f32
    %121 = vector.broadcast %cst_42 : f32 to vector<2x32xf32>
    %122 = arith.addf %121, %120 : vector<2x32xf32>
    %123 = arith.divf %121, %122 : vector<2x32xf32>
    %124 = vector.extract_strided_slice %112 {offsets = [0, 32], sizes = [2, 32], strides = [1, 1]} : vector<2x96xf32> to vector<2x32xf32>
    %125 = vector.extract_strided_slice %115 {offsets = [0, 32], sizes = [2, 32], strides = [1, 1]} : vector<2x96xf32> to vector<2x32xf32>
    %126 = arith.addf %124, %125 : vector<2x32xf32>
    %127 = arith.negf %126 : vector<2x32xf32>
    %128 = math.exp %127 : vector<2x32xf32>
    %cst_43 = arith.constant 1.000000e+00 : f32
    %129 = vector.broadcast %cst_43 : f32 to vector<2x32xf32>
    %130 = arith.addf %129, %128 : vector<2x32xf32>
    %131 = arith.divf %129, %130 : vector<2x32xf32>
    %132 = vector.extract_strided_slice %112 {offsets = [0, 64], sizes = [2, 32], strides = [1, 1]} : vector<2x96xf32> to vector<2x32xf32>
    %133 = vector.extract_strided_slice %115 {offsets = [0, 64], sizes = [2, 32], strides = [1, 1]} : vector<2x96xf32> to vector<2x32xf32>
    %134 = arith.mulf %123, %133 : vector<2x32xf32>
    %135 = arith.addf %132, %134 : vector<2x32xf32>
    %136 = math.tanh %135 : vector<2x32xf32>
    %cst_44 = arith.constant 1.000000e+00 : f32
    %137 = vector.broadcast %cst_44 : f32 to vector<2x32xf32>
    %138 = arith.subf %137, %131 : vector<2x32xf32>
    %139 = arith.mulf %138, %136 : vector<2x32xf32>
    %140 = arith.mulf %131, %73 : vector<2x32xf32>
    %141 = arith.addf %139, %140 : vector<2x32xf32>
    %c6_45 = arith.constant 6 : index
    %c0_46 = arith.constant 0 : index
    %c0_47 = arith.constant 0 : index
    %142 = vector.load %arg10[%c6_45, %c0_46, %c0_47] : memref<8x2x32xf32, #tpu.memory_space<vmem>>, vector<1x2x32xf32>
    %143 = vector.shape_cast %142 : vector<1x2x32xf32> to vector<2x32xf32>
    %144 = vector.shape_cast %141 : vector<2x32xf32> to vector<1x2x32xf32>
    tpu.vector_store %arg10[%c6_45, %c0_46, %c0_47], %144 {strides = array<i32>} : memref<8x2x32xf32, #tpu.memory_space<vmem>>, vector<1x2x32xf32>,
    %c2 = arith.constant 2 : index
    %c0_48 = arith.constant 0 : index
    %c0_49 = arith.constant 0 : index
    %145 = vector.load %arg1[%c2, %c0_48, %c0_49] : memref<8x2x96xf32, #tpu.memory_space<vmem>>, vector<1x2x96xf32>
    %146 = vector.shape_cast %145 : vector<1x2x96xf32> to vector<2x96xf32>
    %cst_50 = arith.constant dense<0.000000e+00> : vector<2x96xf32>
    %147 = tpu.matmul %107, %5, %cst_50 {dimension_numbers = #tpu.dot_dimension_numbers<[1], [0], [0], [1], [0, 0, 1, 1], [], []>} : vector<2x32xf32>, vector<32x96xf32>, vector<2x96xf32> -> vector<2x96xf32>
    %148 = vector.broadcast %7 : vector<1x96xf32> to vector<2x96xf32>
    %149 = arith.addf %147, %148 : vector<2x96xf32>
    %150 = vector.extract_strided_slice %146 {offsets = [0, 0], sizes = [2, 32], strides = [1, 1]} : vector<2x96xf32> to vector<2x32xf32>
    %151 = vector.extract_strided_slice %149 {offsets = [0, 0], sizes = [2, 32], strides = [1, 1]} : vector<2x96xf32> to vector<2x32xf32>
    %152 = arith.addf %150, %151 : vector<2x32xf32>
    %153 = arith.negf %152 : vector<2x32xf32>
    %154 = math.exp %153 : vector<2x32xf32>
    %cst_51 = arith.constant 1.000000e+00 : f32
    %155 = vector.broadcast %cst_51 : f32 to vector<2x32xf32>
    %156 = arith.addf %155, %154 : vector<2x32xf32>
    %157 = arith.divf %155, %156 : vector<2x32xf32>
    %158 = vector.extract_strided_slice %146 {offsets = [0, 32], sizes = [2, 32], strides = [1, 1]} : vector<2x96xf32> to vector<2x32xf32>
    %159 = vector.extract_strided_slice %149 {offsets = [0, 32], sizes = [2, 32], strides = [1, 1]} : vector<2x96xf32> to vector<2x32xf32>
    %160 = arith.addf %158, %159 : vector<2x32xf32>
    %161 = arith.negf %160 : vector<2x32xf32>
    %162 = math.exp %161 : vector<2x32xf32>
    %cst_52 = arith.constant 1.000000e+00 : f32
    %163 = vector.broadcast %cst_52 : f32 to vector<2x32xf32>
    %164 = arith.addf %163, %162 : vector<2x32xf32>
    %165 = arith.divf %163, %164 : vector<2x32xf32>
    %166 = vector.extract_strided_slice %146 {offsets = [0, 64], sizes = [2, 32], strides = [1, 1]} : vector<2x96xf32> to vector<2x32xf32>
    %167 = vector.extract_strided_slice %149 {offsets = [0, 64], sizes = [2, 32], strides = [1, 1]} : vector<2x96xf32> to vector<2x32xf32>
    %168 = arith.mulf %157, %167 : vector<2x32xf32>
    %169 = arith.addf %166, %168 : vector<2x32xf32>
    %170 = math.tanh %169 : vector<2x32xf32>
    %cst_53 = arith.constant 1.000000e+00 : f32
    %171 = vector.broadcast %cst_53 : f32 to vector<2x32xf32>
    %172 = arith.subf %171, %165 : vector<2x32xf32>
    %173 = arith.mulf %172, %170 : vector<2x32xf32>
    %174 = arith.mulf %165, %107 : vector<2x32xf32>
    %175 = arith.addf %173, %174 : vector<2x32xf32>
    %c2_54 = arith.constant 2 : index
    %c0_55 = arith.constant 0 : index
    %c0_56 = arith.constant 0 : index
    %176 = vector.load %arg9[%c2_54, %c0_55, %c0_56] : memref<8x2x32xf32, #tpu.memory_space<vmem>>, vector<1x2x32xf32>
    %177 = vector.shape_cast %176 : vector<1x2x32xf32> to vector<2x32xf32>
    %178 = vector.shape_cast %175 : vector<2x32xf32> to vector<1x2x32xf32>
    tpu.vector_store %arg9[%c2_54, %c0_55, %c0_56], %178 {strides = array<i32>} : memref<8x2x32xf32, #tpu.memory_space<vmem>>, vector<1x2x32xf32>,
    %c5 = arith.constant 5 : index
    %c0_57 = arith.constant 0 : index
    %c0_58 = arith.constant 0 : index
    %179 = vector.load %arg2[%c5, %c0_57, %c0_58] : memref<8x2x96xf32, #tpu.memory_space<vmem>>, vector<1x2x96xf32>
    %180 = vector.shape_cast %179 : vector<1x2x96xf32> to vector<2x96xf32>
    %cst_59 = arith.constant dense<0.000000e+00> : vector<2x96xf32>
    %181 = tpu.matmul %141, %6, %cst_59 {dimension_numbers = #tpu.dot_dimension_numbers<[1], [0], [0], [1], [0, 0, 1, 1], [], []>} : vector<2x32xf32>, vector<32x96xf32>, vector<2x96xf32> -> vector<2x96xf32>
    %182 = vector.broadcast %8 : vector<1x96xf32> to vector<2x96xf32>
    %183 = arith.addf %181, %182 : vector<2x96xf32>
    %184 = vector.extract_strided_slice %180 {offsets = [0, 0], sizes = [2, 32], strides = [1, 1]} : vector<2x96xf32> to vector<2x32xf32>
    %185 = vector.extract_strided_slice %183 {offsets = [0, 0], sizes = [2, 32], strides = [1, 1]} : vector<2x96xf32> to vector<2x32xf32>
    %186 = arith.addf %184, %185 : vector<2x32xf32>
    %187 = arith.negf %186 : vector<2x32xf32>
    %188 = math.exp %187 : vector<2x32xf32>
    %cst_60 = arith.constant 1.000000e+00 : f32
    %189 = vector.broadcast %cst_60 : f32 to vector<2x32xf32>
    %190 = arith.addf %189, %188 : vector<2x32xf32>
    %191 = arith.divf %189, %190 : vector<2x32xf32>
    %192 = vector.extract_strided_slice %180 {offsets = [0, 32], sizes = [2, 32], strides = [1, 1]} : vector<2x96xf32> to vector<2x32xf32>
    %193 = vector.extract_strided_slice %183 {offsets = [0, 32], sizes = [2, 32], strides = [1, 1]} : vector<2x96xf32> to vector<2x32xf32>
    %194 = arith.addf %192, %193 : vector<2x32xf32>
    %195 = arith.negf %194 : vector<2x32xf32>
    %196 = math.exp %195 : vector<2x32xf32>
    %cst_61 = arith.constant 1.000000e+00 : f32
    %197 = vector.broadcast %cst_61 : f32 to vector<2x32xf32>
    %198 = arith.addf %197, %196 : vector<2x32xf32>
    %199 = arith.divf %197, %198 : vector<2x32xf32>
    %200 = vector.extract_strided_slice %180 {offsets = [0, 64], sizes = [2, 32], strides = [1, 1]} : vector<2x96xf32> to vector<2x32xf32>
    %201 = vector.extract_strided_slice %183 {offsets = [0, 64], sizes = [2, 32], strides = [1, 1]} : vector<2x96xf32> to vector<2x32xf32>
    %202 = arith.mulf %191, %201 : vector<2x32xf32>
    %203 = arith.addf %200, %202 : vector<2x32xf32>
    %204 = math.tanh %203 : vector<2x32xf32>
    %cst_62 = arith.constant 1.000000e+00 : f32
    %205 = vector.broadcast %cst_62 : f32 to vector<2x32xf32>
    %206 = arith.subf %205, %199 : vector<2x32xf32>
    %207 = arith.mulf %206, %204 : vector<2x32xf32>
    %208 = arith.mulf %199, %141 : vector<2x32xf32>
    %209 = arith.addf %207, %208 : vector<2x32xf32>
    %c5_63 = arith.constant 5 : index
    %c0_64 = arith.constant 0 : index
    %c0_65 = arith.constant 0 : index
    %210 = vector.load %arg10[%c5_63, %c0_64, %c0_65] : memref<8x2x32xf32, #tpu.memory_space<vmem>>, vector<1x2x32xf32>
    %211 = vector.shape_cast %210 : vector<1x2x32xf32> to vector<2x32xf32>
    %212 = vector.shape_cast %209 : vector<2x32xf32> to vector<1x2x32xf32>
    tpu.vector_store %arg10[%c5_63, %c0_64, %c0_65], %212 {strides = array<i32>} : memref<8x2x32xf32, #tpu.memory_space<vmem>>, vector<1x2x32xf32>,
    %c3 = arith.constant 3 : index
    %c0_66 = arith.constant 0 : index
    %c0_67 = arith.constant 0 : index
    %213 = vector.load %arg1[%c3, %c0_66, %c0_67] : memref<8x2x96xf32, #tpu.memory_space<vmem>>, vector<1x2x96xf32>
    %214 = vector.shape_cast %213 : vector<1x2x96xf32> to vector<2x96xf32>
    %cst_68 = arith.constant dense<0.000000e+00> : vector<2x96xf32>
    %215 = tpu.matmul %175, %5, %cst_68 {dimension_numbers = #tpu.dot_dimension_numbers<[1], [0], [0], [1], [0, 0, 1, 1], [], []>} : vector<2x32xf32>, vector<32x96xf32>, vector<2x96xf32> -> vector<2x96xf32>
    %216 = vector.broadcast %7 : vector<1x96xf32> to vector<2x96xf32>
    %217 = arith.addf %215, %216 : vector<2x96xf32>
    %218 = vector.extract_strided_slice %214 {offsets = [0, 0], sizes = [2, 32], strides = [1, 1]} : vector<2x96xf32> to vector<2x32xf32>
    %219 = vector.extract_strided_slice %217 {offsets = [0, 0], sizes = [2, 32], strides = [1, 1]} : vector<2x96xf32> to vector<2x32xf32>
    %220 = arith.addf %218, %219 : vector<2x32xf32>
    %221 = arith.negf %220 : vector<2x32xf32>
    %222 = math.exp %221 : vector<2x32xf32>
    %cst_69 = arith.constant 1.000000e+00 : f32
    %223 = vector.broadcast %cst_69 : f32 to vector<2x32xf32>
    %224 = arith.addf %223, %222 : vector<2x32xf32>
    %225 = arith.divf %223, %224 : vector<2x32xf32>
    %226 = vector.extract_strided_slice %214 {offsets = [0, 32], sizes = [2, 32], strides = [1, 1]} : vector<2x96xf32> to vector<2x32xf32>
    %227 = vector.extract_strided_slice %217 {offsets = [0, 32], sizes = [2, 32], strides = [1, 1]} : vector<2x96xf32> to vector<2x32xf32>
    %228 = arith.addf %226, %227 : vector<2x32xf32>
    %229 = arith.negf %228 : vector<2x32xf32>
    %230 = math.exp %229 : vector<2x32xf32>
    %cst_70 = arith.constant 1.000000e+00 : f32
    %231 = vector.broadcast %cst_70 : f32 to vector<2x32xf32>
    %232 = arith.addf %231, %230 : vector<2x32xf32>
    %233 = arith.divf %231, %232 : vector<2x32xf32>
    %234 = vector.extract_strided_slice %214 {offsets = [0, 64], sizes = [2, 32], strides = [1, 1]} : vector<2x96xf32> to vector<2x32xf32>
    %235 = vector.extract_strided_slice %217 {offsets = [0, 64], sizes = [2, 32], strides = [1, 1]} : vector<2x96xf32> to vector<2x32xf32>
    %236 = arith.mulf %225, %235 : vector<2x32xf32>
    %237 = arith.addf %234, %236 : vector<2x32xf32>
    %238 = math.tanh %237 : vector<2x32xf32>
    %cst_71 = arith.constant 1.000000e+00 : f32
    %239 = vector.broadcast %cst_71 : f32 to vector<2x32xf32>
    %240 = arith.subf %239, %233 : vector<2x32xf32>
    %241 = arith.mulf %240, %238 : vector<2x32xf32>
    %242 = arith.mulf %233, %175 : vector<2x32xf32>
    %243 = arith.addf %241, %242 : vector<2x32xf32>
    %c3_72 = arith.constant 3 : index
    %c0_73 = arith.constant 0 : index
    %c0_74 = arith.constant 0 : index
    %244 = vector.load %arg9[%c3_72, %c0_73, %c0_74] : memref<8x2x32xf32, #tpu.memory_space<vmem>>, vector<1x2x32xf32>
    %245 = vector.shape_cast %244 : vector<1x2x32xf32> to vector<2x32xf32>
    %246 = vector.shape_cast %243 : vector<2x32xf32> to vector<1x2x32xf32>
    tpu.vector_store %arg9[%c3_72, %c0_73, %c0_74], %246 {strides = array<i32>} : memref<8x2x32xf32, #tpu.memory_space<vmem>>, vector<1x2x32xf32>,
    %c4 = arith.constant 4 : index
    %c0_75 = arith.constant 0 : index
    %c0_76 = arith.constant 0 : index
    %247 = vector.load %arg2[%c4, %c0_75, %c0_76] : memref<8x2x96xf32, #tpu.memory_space<vmem>>, vector<1x2x96xf32>
    %248 = vector.shape_cast %247 : vector<1x2x96xf32> to vector<2x96xf32>
    %cst_77 = arith.constant dense<0.000000e+00> : vector<2x96xf32>
    %249 = tpu.matmul %209, %6, %cst_77 {dimension_numbers = #tpu.dot_dimension_numbers<[1], [0], [0], [1], [0, 0, 1, 1], [], []>} : vector<2x32xf32>, vector<32x96xf32>, vector<2x96xf32> -> vector<2x96xf32>
    %250 = vector.broadcast %8 : vector<1x96xf32> to vector<2x96xf32>
    %251 = arith.addf %249, %250 : vector<2x96xf32>
    %252 = vector.extract_strided_slice %248 {offsets = [0, 0], sizes = [2, 32], strides = [1, 1]} : vector<2x96xf32> to vector<2x32xf32>
    %253 = vector.extract_strided_slice %251 {offsets = [0, 0], sizes = [2, 32], strides = [1, 1]} : vector<2x96xf32> to vector<2x32xf32>
    %254 = arith.addf %252, %253 : vector<2x32xf32>
    %255 = arith.negf %254 : vector<2x32xf32>
    %256 = math.exp %255 : vector<2x32xf32>
    %cst_78 = arith.constant 1.000000e+00 : f32
    %257 = vector.broadcast %cst_78 : f32 to vector<2x32xf32>
    %258 = arith.addf %257, %256 : vector<2x32xf32>
    %259 = arith.divf %257, %258 : vector<2x32xf32>
    %260 = vector.extract_strided_slice %248 {offsets = [0, 32], sizes = [2, 32], strides = [1, 1]} : vector<2x96xf32> to vector<2x32xf32>
    %261 = vector.extract_strided_slice %251 {offsets = [0, 32], sizes = [2, 32], strides = [1, 1]} : vector<2x96xf32> to vector<2x32xf32>
    %262 = arith.addf %260, %261 : vector<2x32xf32>
    %263 = arith.negf %262 : vector<2x32xf32>
    %264 = math.exp %263 : vector<2x32xf32>
    %cst_79 = arith.constant 1.000000e+00 : f32
    %265 = vector.broadcast %cst_79 : f32 to vector<2x32xf32>
    %266 = arith.addf %265, %264 : vector<2x32xf32>
    %267 = arith.divf %265, %266 : vector<2x32xf32>
    %268 = vector.extract_strided_slice %248 {offsets = [0, 64], sizes = [2, 32], strides = [1, 1]} : vector<2x96xf32> to vector<2x32xf32>
    %269 = vector.extract_strided_slice %251 {offsets = [0, 64], sizes = [2, 32], strides = [1, 1]} : vector<2x96xf32> to vector<2x32xf32>
    %270 = arith.mulf %259, %269 : vector<2x32xf32>
    %271 = arith.addf %268, %270 : vector<2x32xf32>
    %272 = math.tanh %271 : vector<2x32xf32>
    %cst_80 = arith.constant 1.000000e+00 : f32
    %273 = vector.broadcast %cst_80 : f32 to vector<2x32xf32>
    %274 = arith.subf %273, %267 : vector<2x32xf32>
    %275 = arith.mulf %274, %272 : vector<2x32xf32>
    %276 = arith.mulf %267, %209 : vector<2x32xf32>
    %277 = arith.addf %275, %276 : vector<2x32xf32>
    %c4_81 = arith.constant 4 : index
    %c0_82 = arith.constant 0 : index
    %c0_83 = arith.constant 0 : index
    %278 = vector.load %arg10[%c4_81, %c0_82, %c0_83] : memref<8x2x32xf32, #tpu.memory_space<vmem>>, vector<1x2x32xf32>
    %279 = vector.shape_cast %278 : vector<1x2x32xf32> to vector<2x32xf32>
    %280 = vector.shape_cast %277 : vector<2x32xf32> to vector<1x2x32xf32>
    tpu.vector_store %arg10[%c4_81, %c0_82, %c0_83], %280 {strides = array<i32>} : memref<8x2x32xf32, #tpu.memory_space<vmem>>, vector<1x2x32xf32>,
    %c4_84 = arith.constant 4 : index
    %c0_85 = arith.constant 0 : index
    %c0_86 = arith.constant 0 : index
    %281 = vector.load %arg1[%c4_84, %c0_85, %c0_86] : memref<8x2x96xf32, #tpu.memory_space<vmem>>, vector<1x2x96xf32>
    %282 = vector.shape_cast %281 : vector<1x2x96xf32> to vector<2x96xf32>
    %cst_87 = arith.constant dense<0.000000e+00> : vector<2x96xf32>
    %283 = tpu.matmul %243, %5, %cst_87 {dimension_numbers = #tpu.dot_dimension_numbers<[1], [0], [0], [1], [0, 0, 1, 1], [], []>} : vector<2x32xf32>, vector<32x96xf32>, vector<2x96xf32> -> vector<2x96xf32>
    %284 = vector.broadcast %7 : vector<1x96xf32> to vector<2x96xf32>
    %285 = arith.addf %283, %284 : vector<2x96xf32>
    %286 = vector.extract_strided_slice %282 {offsets = [0, 0], sizes = [2, 32], strides = [1, 1]} : vector<2x96xf32> to vector<2x32xf32>
    %287 = vector.extract_strided_slice %285 {offsets = [0, 0], sizes = [2, 32], strides = [1, 1]} : vector<2x96xf32> to vector<2x32xf32>
    %288 = arith.addf %286, %287 : vector<2x32xf32>
    %289 = arith.negf %288 : vector<2x32xf32>
    %290 = math.exp %289 : vector<2x32xf32>
    %cst_88 = arith.constant 1.000000e+00 : f32
    %291 = vector.broadcast %cst_88 : f32 to vector<2x32xf32>
    %292 = arith.addf %291, %290 : vector<2x32xf32>
    %293 = arith.divf %291, %292 : vector<2x32xf32>
    %294 = vector.extract_strided_slice %282 {offsets = [0, 32], sizes = [2, 32], strides = [1, 1]} : vector<2x96xf32> to vector<2x32xf32>
    %295 = vector.extract_strided_slice %285 {offsets = [0, 32], sizes = [2, 32], strides = [1, 1]} : vector<2x96xf32> to vector<2x32xf32>
    %296 = arith.addf %294, %295 : vector<2x32xf32>
    %297 = arith.negf %296 : vector<2x32xf32>
    %298 = math.exp %297 : vector<2x32xf32>
    %cst_89 = arith.constant 1.000000e+00 : f32
    %299 = vector.broadcast %cst_89 : f32 to vector<2x32xf32>
    %300 = arith.addf %299, %298 : vector<2x32xf32>
    %301 = arith.divf %299, %300 : vector<2x32xf32>
    %302 = vector.extract_strided_slice %282 {offsets = [0, 64], sizes = [2, 32], strides = [1, 1]} : vector<2x96xf32> to vector<2x32xf32>
    %303 = vector.extract_strided_slice %285 {offsets = [0, 64], sizes = [2, 32], strides = [1, 1]} : vector<2x96xf32> to vector<2x32xf32>
    %304 = arith.mulf %293, %303 : vector<2x32xf32>
    %305 = arith.addf %302, %304 : vector<2x32xf32>
    %306 = math.tanh %305 : vector<2x32xf32>
    %cst_90 = arith.constant 1.000000e+00 : f32
    %307 = vector.broadcast %cst_90 : f32 to vector<2x32xf32>
    %308 = arith.subf %307, %301 : vector<2x32xf32>
    %309 = arith.mulf %308, %306 : vector<2x32xf32>
    %310 = arith.mulf %301, %243 : vector<2x32xf32>
    %311 = arith.addf %309, %310 : vector<2x32xf32>
    %c4_91 = arith.constant 4 : index
    %c0_92 = arith.constant 0 : index
    %c0_93 = arith.constant 0 : index
    %312 = vector.load %arg9[%c4_91, %c0_92, %c0_93] : memref<8x2x32xf32, #tpu.memory_space<vmem>>, vector<1x2x32xf32>
    %313 = vector.shape_cast %312 : vector<1x2x32xf32> to vector<2x32xf32>
    %314 = vector.shape_cast %311 : vector<2x32xf32> to vector<1x2x32xf32>
    tpu.vector_store %arg9[%c4_91, %c0_92, %c0_93], %314 {strides = array<i32>} : memref<8x2x32xf32, #tpu.memory_space<vmem>>, vector<1x2x32xf32>,
    %c3_94 = arith.constant 3 : index
    %c0_95 = arith.constant 0 : index
    %c0_96 = arith.constant 0 : index
    %315 = vector.load %arg2[%c3_94, %c0_95, %c0_96] : memref<8x2x96xf32, #tpu.memory_space<vmem>>, vector<1x2x96xf32>
    %316 = vector.shape_cast %315 : vector<1x2x96xf32> to vector<2x96xf32>
    %cst_97 = arith.constant dense<0.000000e+00> : vector<2x96xf32>
    %317 = tpu.matmul %277, %6, %cst_97 {dimension_numbers = #tpu.dot_dimension_numbers<[1], [0], [0], [1], [0, 0, 1, 1], [], []>} : vector<2x32xf32>, vector<32x96xf32>, vector<2x96xf32> -> vector<2x96xf32>
    %318 = vector.broadcast %8 : vector<1x96xf32> to vector<2x96xf32>
    %319 = arith.addf %317, %318 : vector<2x96xf32>
    %320 = vector.extract_strided_slice %316 {offsets = [0, 0], sizes = [2, 32], strides = [1, 1]} : vector<2x96xf32> to vector<2x32xf32>
    %321 = vector.extract_strided_slice %319 {offsets = [0, 0], sizes = [2, 32], strides = [1, 1]} : vector<2x96xf32> to vector<2x32xf32>
    %322 = arith.addf %320, %321 : vector<2x32xf32>
    %323 = arith.negf %322 : vector<2x32xf32>
    %324 = math.exp %323 : vector<2x32xf32>
    %cst_98 = arith.constant 1.000000e+00 : f32
    %325 = vector.broadcast %cst_98 : f32 to vector<2x32xf32>
    %326 = arith.addf %325, %324 : vector<2x32xf32>
    %327 = arith.divf %325, %326 : vector<2x32xf32>
    %328 = vector.extract_strided_slice %316 {offsets = [0, 32], sizes = [2, 32], strides = [1, 1]} : vector<2x96xf32> to vector<2x32xf32>
    %329 = vector.extract_strided_slice %319 {offsets = [0, 32], sizes = [2, 32], strides = [1, 1]} : vector<2x96xf32> to vector<2x32xf32>
    %330 = arith.addf %328, %329 : vector<2x32xf32>
    %331 = arith.negf %330 : vector<2x32xf32>
    %332 = math.exp %331 : vector<2x32xf32>
    %cst_99 = arith.constant 1.000000e+00 : f32
    %333 = vector.broadcast %cst_99 : f32 to vector<2x32xf32>
    %334 = arith.addf %333, %332 : vector<2x32xf32>
    %335 = arith.divf %333, %334 : vector<2x32xf32>
    %336 = vector.extract_strided_slice %316 {offsets = [0, 64], sizes = [2, 32], strides = [1, 1]} : vector<2x96xf32> to vector<2x32xf32>
    %337 = vector.extract_strided_slice %319 {offsets = [0, 64], sizes = [2, 32], strides = [1, 1]} : vector<2x96xf32> to vector<2x32xf32>
    %338 = arith.mulf %327, %337 : vector<2x32xf32>
    %339 = arith.addf %336, %338 : vector<2x32xf32>
    %340 = math.tanh %339 : vector<2x32xf32>
    %cst_100 = arith.constant 1.000000e+00 : f32
    %341 = vector.broadcast %cst_100 : f32 to vector<2x32xf32>
    %342 = arith.subf %341, %335 : vector<2x32xf32>
    %343 = arith.mulf %342, %340 : vector<2x32xf32>
    %344 = arith.mulf %335, %277 : vector<2x32xf32>
    %345 = arith.addf %343, %344 : vector<2x32xf32>
    %c3_101 = arith.constant 3 : index
    %c0_102 = arith.constant 0 : index
    %c0_103 = arith.constant 0 : index
    %346 = vector.load %arg10[%c3_101, %c0_102, %c0_103] : memref<8x2x32xf32, #tpu.memory_space<vmem>>, vector<1x2x32xf32>
    %347 = vector.shape_cast %346 : vector<1x2x32xf32> to vector<2x32xf32>
    %348 = vector.shape_cast %345 : vector<2x32xf32> to vector<1x2x32xf32>
    tpu.vector_store %arg10[%c3_101, %c0_102, %c0_103], %348 {strides = array<i32>} : memref<8x2x32xf32, #tpu.memory_space<vmem>>, vector<1x2x32xf32>,
    %c5_104 = arith.constant 5 : index
    %c0_105 = arith.constant 0 : index
    %c0_106 = arith.constant 0 : index
    %349 = vector.load %arg1[%c5_104, %c0_105, %c0_106] : memref<8x2x96xf32, #tpu.memory_space<vmem>>, vector<1x2x96xf32>
    %350 = vector.shape_cast %349 : vector<1x2x96xf32> to vector<2x96xf32>
    %cst_107 = arith.constant dense<0.000000e+00> : vector<2x96xf32>
    %351 = tpu.matmul %311, %5, %cst_107 {dimension_numbers = #tpu.dot_dimension_numbers<[1], [0], [0], [1], [0, 0, 1, 1], [], []>} : vector<2x32xf32>, vector<32x96xf32>, vector<2x96xf32> -> vector<2x96xf32>
    %352 = vector.broadcast %7 : vector<1x96xf32> to vector<2x96xf32>
    %353 = arith.addf %351, %352 : vector<2x96xf32>
    %354 = vector.extract_strided_slice %350 {offsets = [0, 0], sizes = [2, 32], strides = [1, 1]} : vector<2x96xf32> to vector<2x32xf32>
    %355 = vector.extract_strided_slice %353 {offsets = [0, 0], sizes = [2, 32], strides = [1, 1]} : vector<2x96xf32> to vector<2x32xf32>
    %356 = arith.addf %354, %355 : vector<2x32xf32>
    %357 = arith.negf %356 : vector<2x32xf32>
    %358 = math.exp %357 : vector<2x32xf32>
    %cst_108 = arith.constant 1.000000e+00 : f32
    %359 = vector.broadcast %cst_108 : f32 to vector<2x32xf32>
    %360 = arith.addf %359, %358 : vector<2x32xf32>
    %361 = arith.divf %359, %360 : vector<2x32xf32>
    %362 = vector.extract_strided_slice %350 {offsets = [0, 32], sizes = [2, 32], strides = [1, 1]} : vector<2x96xf32> to vector<2x32xf32>
    %363 = vector.extract_strided_slice %353 {offsets = [0, 32], sizes = [2, 32], strides = [1, 1]} : vector<2x96xf32> to vector<2x32xf32>
    %364 = arith.addf %362, %363 : vector<2x32xf32>
    %365 = arith.negf %364 : vector<2x32xf32>
    %366 = math.exp %365 : vector<2x32xf32>
    %cst_109 = arith.constant 1.000000e+00 : f32
    %367 = vector.broadcast %cst_109 : f32 to vector<2x32xf32>
    %368 = arith.addf %367, %366 : vector<2x32xf32>
    %369 = arith.divf %367, %368 : vector<2x32xf32>
    %370 = vector.extract_strided_slice %350 {offsets = [0, 64], sizes = [2, 32], strides = [1, 1]} : vector<2x96xf32> to vector<2x32xf32>
    %371 = vector.extract_strided_slice %353 {offsets = [0, 64], sizes = [2, 32], strides = [1, 1]} : vector<2x96xf32> to vector<2x32xf32>
    %372 = arith.mulf %361, %371 : vector<2x32xf32>
    %373 = arith.addf %370, %372 : vector<2x32xf32>
    %374 = math.tanh %373 : vector<2x32xf32>
    %cst_110 = arith.constant 1.000000e+00 : f32
    %375 = vector.broadcast %cst_110 : f32 to vector<2x32xf32>
    %376 = arith.subf %375, %369 : vector<2x32xf32>
    %377 = arith.mulf %376, %374 : vector<2x32xf32>
    %378 = arith.mulf %369, %311 : vector<2x32xf32>
    %379 = arith.addf %377, %378 : vector<2x32xf32>
    %c5_111 = arith.constant 5 : index
    %c0_112 = arith.constant 0 : index
    %c0_113 = arith.constant 0 : index
    %380 = vector.load %arg9[%c5_111, %c0_112, %c0_113] : memref<8x2x32xf32, #tpu.memory_space<vmem>>, vector<1x2x32xf32>
    %381 = vector.shape_cast %380 : vector<1x2x32xf32> to vector<2x32xf32>
    %382 = vector.shape_cast %379 : vector<2x32xf32> to vector<1x2x32xf32>
    tpu.vector_store %arg9[%c5_111, %c0_112, %c0_113], %382 {strides = array<i32>} : memref<8x2x32xf32, #tpu.memory_space<vmem>>, vector<1x2x32xf32>,
    %c2_114 = arith.constant 2 : index
    %c0_115 = arith.constant 0 : index
    %c0_116 = arith.constant 0 : index
    %383 = vector.load %arg2[%c2_114, %c0_115, %c0_116] : memref<8x2x96xf32, #tpu.memory_space<vmem>>, vector<1x2x96xf32>
    %384 = vector.shape_cast %383 : vector<1x2x96xf32> to vector<2x96xf32>
    %cst_117 = arith.constant dense<0.000000e+00> : vector<2x96xf32>
    %385 = tpu.matmul %345, %6, %cst_117 {dimension_numbers = #tpu.dot_dimension_numbers<[1], [0], [0], [1], [0, 0, 1, 1], [], []>} : vector<2x32xf32>, vector<32x96xf32>, vector<2x96xf32> -> vector<2x96xf32>
    %386 = vector.broadcast %8 : vector<1x96xf32> to vector<2x96xf32>
    %387 = arith.addf %385, %386 : vector<2x96xf32>
    %388 = vector.extract_strided_slice %384 {offsets = [0, 0], sizes = [2, 32], strides = [1, 1]} : vector<2x96xf32> to vector<2x32xf32>
    %389 = vector.extract_strided_slice %387 {offsets = [0, 0], sizes = [2, 32], strides = [1, 1]} : vector<2x96xf32> to vector<2x32xf32>
    %390 = arith.addf %388, %389 : vector<2x32xf32>
    %391 = arith.negf %390 : vector<2x32xf32>
    %392 = math.exp %391 : vector<2x32xf32>
    %cst_118 = arith.constant 1.000000e+00 : f32
    %393 = vector.broadcast %cst_118 : f32 to vector<2x32xf32>
    %394 = arith.addf %393, %392 : vector<2x32xf32>
    %395 = arith.divf %393, %394 : vector<2x32xf32>
    %396 = vector.extract_strided_slice %384 {offsets = [0, 32], sizes = [2, 32], strides = [1, 1]} : vector<2x96xf32> to vector<2x32xf32>
    %397 = vector.extract_strided_slice %387 {offsets = [0, 32], sizes = [2, 32], strides = [1, 1]} : vector<2x96xf32> to vector<2x32xf32>
    %398 = arith.addf %396, %397 : vector<2x32xf32>
    %399 = arith.negf %398 : vector<2x32xf32>
    %400 = math.exp %399 : vector<2x32xf32>
    %cst_119 = arith.constant 1.000000e+00 : f32
    %401 = vector.broadcast %cst_119 : f32 to vector<2x32xf32>
    %402 = arith.addf %401, %400 : vector<2x32xf32>
    %403 = arith.divf %401, %402 : vector<2x32xf32>
    %404 = vector.extract_strided_slice %384 {offsets = [0, 64], sizes = [2, 32], strides = [1, 1]} : vector<2x96xf32> to vector<2x32xf32>
    %405 = vector.extract_strided_slice %387 {offsets = [0, 64], sizes = [2, 32], strides = [1, 1]} : vector<2x96xf32> to vector<2x32xf32>
    %406 = arith.mulf %395, %405 : vector<2x32xf32>
    %407 = arith.addf %404, %406 : vector<2x32xf32>
    %408 = math.tanh %407 : vector<2x32xf32>
    %cst_120 = arith.constant 1.000000e+00 : f32
    %409 = vector.broadcast %cst_120 : f32 to vector<2x32xf32>
    %410 = arith.subf %409, %403 : vector<2x32xf32>
    %411 = arith.mulf %410, %408 : vector<2x32xf32>
    %412 = arith.mulf %403, %345 : vector<2x32xf32>
    %413 = arith.addf %411, %412 : vector<2x32xf32>
    %c2_121 = arith.constant 2 : index
    %c0_122 = arith.constant 0 : index
    %c0_123 = arith.constant 0 : index
    %414 = vector.load %arg10[%c2_121, %c0_122, %c0_123] : memref<8x2x32xf32, #tpu.memory_space<vmem>>, vector<1x2x32xf32>
    %415 = vector.shape_cast %414 : vector<1x2x32xf32> to vector<2x32xf32>
    %416 = vector.shape_cast %413 : vector<2x32xf32> to vector<1x2x32xf32>
    tpu.vector_store %arg10[%c2_121, %c0_122, %c0_123], %416 {strides = array<i32>} : memref<8x2x32xf32, #tpu.memory_space<vmem>>, vector<1x2x32xf32>,
    %c6_124 = arith.constant 6 : index
    %c0_125 = arith.constant 0 : index
    %c0_126 = arith.constant 0 : index
    %417 = vector.load %arg1[%c6_124, %c0_125, %c0_126] : memref<8x2x96xf32, #tpu.memory_space<vmem>>, vector<1x2x96xf32>
    %418 = vector.shape_cast %417 : vector<1x2x96xf32> to vector<2x96xf32>
    %cst_127 = arith.constant dense<0.000000e+00> : vector<2x96xf32>
    %419 = tpu.matmul %379, %5, %cst_127 {dimension_numbers = #tpu.dot_dimension_numbers<[1], [0], [0], [1], [0, 0, 1, 1], [], []>} : vector<2x32xf32>, vector<32x96xf32>, vector<2x96xf32> -> vector<2x96xf32>
    %420 = vector.broadcast %7 : vector<1x96xf32> to vector<2x96xf32>
    %421 = arith.addf %419, %420 : vector<2x96xf32>
    %422 = vector.extract_strided_slice %418 {offsets = [0, 0], sizes = [2, 32], strides = [1, 1]} : vector<2x96xf32> to vector<2x32xf32>
    %423 = vector.extract_strided_slice %421 {offsets = [0, 0], sizes = [2, 32], strides = [1, 1]} : vector<2x96xf32> to vector<2x32xf32>
    %424 = arith.addf %422, %423 : vector<2x32xf32>
    %425 = arith.negf %424 : vector<2x32xf32>
    %426 = math.exp %425 : vector<2x32xf32>
    %cst_128 = arith.constant 1.000000e+00 : f32
    %427 = vector.broadcast %cst_128 : f32 to vector<2x32xf32>
    %428 = arith.addf %427, %426 : vector<2x32xf32>
    %429 = arith.divf %427, %428 : vector<2x32xf32>
    %430 = vector.extract_strided_slice %418 {offsets = [0, 32], sizes = [2, 32], strides = [1, 1]} : vector<2x96xf32> to vector<2x32xf32>
    %431 = vector.extract_strided_slice %421 {offsets = [0, 32], sizes = [2, 32], strides = [1, 1]} : vector<2x96xf32> to vector<2x32xf32>
    %432 = arith.addf %430, %431 : vector<2x32xf32>
    %433 = arith.negf %432 : vector<2x32xf32>
    %434 = math.exp %433 : vector<2x32xf32>
    %cst_129 = arith.constant 1.000000e+00 : f32
    %435 = vector.broadcast %cst_129 : f32 to vector<2x32xf32>
    %436 = arith.addf %435, %434 : vector<2x32xf32>
    %437 = arith.divf %435, %436 : vector<2x32xf32>
    %438 = vector.extract_strided_slice %418 {offsets = [0, 64], sizes = [2, 32], strides = [1, 1]} : vector<2x96xf32> to vector<2x32xf32>
    %439 = vector.extract_strided_slice %421 {offsets = [0, 64], sizes = [2, 32], strides = [1, 1]} : vector<2x96xf32> to vector<2x32xf32>
    %440 = arith.mulf %429, %439 : vector<2x32xf32>
    %441 = arith.addf %438, %440 : vector<2x32xf32>
    %442 = math.tanh %441 : vector<2x32xf32>
    %cst_130 = arith.constant 1.000000e+00 : f32
    %443 = vector.broadcast %cst_130 : f32 to vector<2x32xf32>
    %444 = arith.subf %443, %437 : vector<2x32xf32>
    %445 = arith.mulf %444, %442 : vector<2x32xf32>
    %446 = arith.mulf %437, %379 : vector<2x32xf32>
    %447 = arith.addf %445, %446 : vector<2x32xf32>
    %c6_131 = arith.constant 6 : index
    %c0_132 = arith.constant 0 : index
    %c0_133 = arith.constant 0 : index
    %448 = vector.load %arg9[%c6_131, %c0_132, %c0_133] : memref<8x2x32xf32, #tpu.memory_space<vmem>>, vector<1x2x32xf32>
    %449 = vector.shape_cast %448 : vector<1x2x32xf32> to vector<2x32xf32>
    %450 = vector.shape_cast %447 : vector<2x32xf32> to vector<1x2x32xf32>
    tpu.vector_store %arg9[%c6_131, %c0_132, %c0_133], %450 {strides = array<i32>} : memref<8x2x32xf32, #tpu.memory_space<vmem>>, vector<1x2x32xf32>,
    %c1_134 = arith.constant 1 : index
    %c0_135 = arith.constant 0 : index
    %c0_136 = arith.constant 0 : index
    %451 = vector.load %arg2[%c1_134, %c0_135, %c0_136] : memref<8x2x96xf32, #tpu.memory_space<vmem>>, vector<1x2x96xf32>
    %452 = vector.shape_cast %451 : vector<1x2x96xf32> to vector<2x96xf32>
    %cst_137 = arith.constant dense<0.000000e+00> : vector<2x96xf32>
    %453 = tpu.matmul %413, %6, %cst_137 {dimension_numbers = #tpu.dot_dimension_numbers<[1], [0], [0], [1], [0, 0, 1, 1], [], []>} : vector<2x32xf32>, vector<32x96xf32>, vector<2x96xf32> -> vector<2x96xf32>
    %454 = vector.broadcast %8 : vector<1x96xf32> to vector<2x96xf32>
    %455 = arith.addf %453, %454 : vector<2x96xf32>
    %456 = vector.extract_strided_slice %452 {offsets = [0, 0], sizes = [2, 32], strides = [1, 1]} : vector<2x96xf32> to vector<2x32xf32>
    %457 = vector.extract_strided_slice %455 {offsets = [0, 0], sizes = [2, 32], strides = [1, 1]} : vector<2x96xf32> to vector<2x32xf32>
    %458 = arith.addf %456, %457 : vector<2x32xf32>
    %459 = arith.negf %458 : vector<2x32xf32>
    %460 = math.exp %459 : vector<2x32xf32>
    %cst_138 = arith.constant 1.000000e+00 : f32
    %461 = vector.broadcast %cst_138 : f32 to vector<2x32xf32>
    %462 = arith.addf %461, %460 : vector<2x32xf32>
    %463 = arith.divf %461, %462 : vector<2x32xf32>
    %464 = vector.extract_strided_slice %452 {offsets = [0, 32], sizes = [2, 32], strides = [1, 1]} : vector<2x96xf32> to vector<2x32xf32>
    %465 = vector.extract_strided_slice %455 {offsets = [0, 32], sizes = [2, 32], strides = [1, 1]} : vector<2x96xf32> to vector<2x32xf32>
    %466 = arith.addf %464, %465 : vector<2x32xf32>
    %467 = arith.negf %466 : vector<2x32xf32>
    %468 = math.exp %467 : vector<2x32xf32>
    %cst_139 = arith.constant 1.000000e+00 : f32
    %469 = vector.broadcast %cst_139 : f32 to vector<2x32xf32>
    %470 = arith.addf %469, %468 : vector<2x32xf32>
    %471 = arith.divf %469, %470 : vector<2x32xf32>
    %472 = vector.extract_strided_slice %452 {offsets = [0, 64], sizes = [2, 32], strides = [1, 1]} : vector<2x96xf32> to vector<2x32xf32>
    %473 = vector.extract_strided_slice %455 {offsets = [0, 64], sizes = [2, 32], strides = [1, 1]} : vector<2x96xf32> to vector<2x32xf32>
    %474 = arith.mulf %463, %473 : vector<2x32xf32>
    %475 = arith.addf %472, %474 : vector<2x32xf32>
    %476 = math.tanh %475 : vector<2x32xf32>
    %cst_140 = arith.constant 1.000000e+00 : f32
    %477 = vector.broadcast %cst_140 : f32 to vector<2x32xf32>
    %478 = arith.subf %477, %471 : vector<2x32xf32>
    %479 = arith.mulf %478, %476 : vector<2x32xf32>
    %480 = arith.mulf %471, %413 : vector<2x32xf32>
    %481 = arith.addf %479, %480 : vector<2x32xf32>
    %c1_141 = arith.constant 1 : index
    %c0_142 = arith.constant 0 : index
    %c0_143 = arith.constant 0 : index
    %482 = vector.load %arg10[%c1_141, %c0_142, %c0_143] : memref<8x2x32xf32, #tpu.memory_space<vmem>>, vector<1x2x32xf32>
    %483 = vector.shape_cast %482 : vector<1x2x32xf32> to vector<2x32xf32>
    %484 = vector.shape_cast %481 : vector<2x32xf32> to vector<1x2x32xf32>
    tpu.vector_store %arg10[%c1_141, %c0_142, %c0_143], %484 {strides = array<i32>} : memref<8x2x32xf32, #tpu.memory_space<vmem>>, vector<1x2x32xf32>,
    %c7_144 = arith.constant 7 : index
    %c0_145 = arith.constant 0 : index
    %c0_146 = arith.constant 0 : index
    %485 = vector.load %arg1[%c7_144, %c0_145, %c0_146] : memref<8x2x96xf32, #tpu.memory_space<vmem>>, vector<1x2x96xf32>
    %486 = vector.shape_cast %485 : vector<1x2x96xf32> to vector<2x96xf32>
    %cst_147 = arith.constant dense<0.000000e+00> : vector<2x96xf32>
    %487 = tpu.matmul %447, %5, %cst_147 {dimension_numbers = #tpu.dot_dimension_numbers<[1], [0], [0], [1], [0, 0, 1, 1], [], []>} : vector<2x32xf32>, vector<32x96xf32>, vector<2x96xf32> -> vector<2x96xf32>
    %488 = vector.broadcast %7 : vector<1x96xf32> to vector<2x96xf32>
    %489 = arith.addf %487, %488 : vector<2x96xf32>
    %490 = vector.extract_strided_slice %486 {offsets = [0, 0], sizes = [2, 32], strides = [1, 1]} : vector<2x96xf32> to vector<2x32xf32>
    %491 = vector.extract_strided_slice %489 {offsets = [0, 0], sizes = [2, 32], strides = [1, 1]} : vector<2x96xf32> to vector<2x32xf32>
    %492 = arith.addf %490, %491 : vector<2x32xf32>
    %493 = arith.negf %492 : vector<2x32xf32>
    %494 = math.exp %493 : vector<2x32xf32>
    %cst_148 = arith.constant 1.000000e+00 : f32
    %495 = vector.broadcast %cst_148 : f32 to vector<2x32xf32>
    %496 = arith.addf %495, %494 : vector<2x32xf32>
    %497 = arith.divf %495, %496 : vector<2x32xf32>
    %498 = vector.extract_strided_slice %486 {offsets = [0, 32], sizes = [2, 32], strides = [1, 1]} : vector<2x96xf32> to vector<2x32xf32>
    %499 = vector.extract_strided_slice %489 {offsets = [0, 32], sizes = [2, 32], strides = [1, 1]} : vector<2x96xf32> to vector<2x32xf32>
    %500 = arith.addf %498, %499 : vector<2x32xf32>
    %501 = arith.negf %500 : vector<2x32xf32>
    %502 = math.exp %501 : vector<2x32xf32>
    %cst_149 = arith.constant 1.000000e+00 : f32
    %503 = vector.broadcast %cst_149 : f32 to vector<2x32xf32>
    %504 = arith.addf %503, %502 : vector<2x32xf32>
    %505 = arith.divf %503, %504 : vector<2x32xf32>
    %506 = vector.extract_strided_slice %486 {offsets = [0, 64], sizes = [2, 32], strides = [1, 1]} : vector<2x96xf32> to vector<2x32xf32>
    %507 = vector.extract_strided_slice %489 {offsets = [0, 64], sizes = [2, 32], strides = [1, 1]} : vector<2x96xf32> to vector<2x32xf32>
    %508 = arith.mulf %497, %507 : vector<2x32xf32>
    %509 = arith.addf %506, %508 : vector<2x32xf32>
    %510 = math.tanh %509 : vector<2x32xf32>
    %cst_150 = arith.constant 1.000000e+00 : f32
    %511 = vector.broadcast %cst_150 : f32 to vector<2x32xf32>
    %512 = arith.subf %511, %505 : vector<2x32xf32>
    %513 = arith.mulf %512, %510 : vector<2x32xf32>
    %514 = arith.mulf %505, %447 : vector<2x32xf32>
    %515 = arith.addf %513, %514 : vector<2x32xf32>
    %c7_151 = arith.constant 7 : index
    %c0_152 = arith.constant 0 : index
    %c0_153 = arith.constant 0 : index
    %516 = vector.load %arg9[%c7_151, %c0_152, %c0_153] : memref<8x2x32xf32, #tpu.memory_space<vmem>>, vector<1x2x32xf32>
    %517 = vector.shape_cast %516 : vector<1x2x32xf32> to vector<2x32xf32>
    %518 = vector.shape_cast %515 : vector<2x32xf32> to vector<1x2x32xf32>
    tpu.vector_store %arg9[%c7_151, %c0_152, %c0_153], %518 {strides = array<i32>} : memref<8x2x32xf32, #tpu.memory_space<vmem>>, vector<1x2x32xf32>,
    %c0_154 = arith.constant 0 : index
    %c0_155 = arith.constant 0 : index
    %c0_156 = arith.constant 0 : index
    %519 = vector.load %arg2[%c0_154, %c0_155, %c0_156] : memref<8x2x96xf32, #tpu.memory_space<vmem>>, vector<1x2x96xf32>
    %520 = vector.shape_cast %519 : vector<1x2x96xf32> to vector<2x96xf32>
    %cst_157 = arith.constant dense<0.000000e+00> : vector<2x96xf32>
    %521 = tpu.matmul %481, %6, %cst_157 {dimension_numbers = #tpu.dot_dimension_numbers<[1], [0], [0], [1], [0, 0, 1, 1], [], []>} : vector<2x32xf32>, vector<32x96xf32>, vector<2x96xf32> -> vector<2x96xf32>
    %522 = vector.broadcast %8 : vector<1x96xf32> to vector<2x96xf32>
    %523 = arith.addf %521, %522 : vector<2x96xf32>
    %524 = vector.extract_strided_slice %520 {offsets = [0, 0], sizes = [2, 32], strides = [1, 1]} : vector<2x96xf32> to vector<2x32xf32>
    %525 = vector.extract_strided_slice %523 {offsets = [0, 0], sizes = [2, 32], strides = [1, 1]} : vector<2x96xf32> to vector<2x32xf32>
    %526 = arith.addf %524, %525 : vector<2x32xf32>
    %527 = arith.negf %526 : vector<2x32xf32>
    %528 = math.exp %527 : vector<2x32xf32>
    %cst_158 = arith.constant 1.000000e+00 : f32
    %529 = vector.broadcast %cst_158 : f32 to vector<2x32xf32>
    %530 = arith.addf %529, %528 : vector<2x32xf32>
    %531 = arith.divf %529, %530 : vector<2x32xf32>
    %532 = vector.extract_strided_slice %520 {offsets = [0, 32], sizes = [2, 32], strides = [1, 1]} : vector<2x96xf32> to vector<2x32xf32>
    %533 = vector.extract_strided_slice %523 {offsets = [0, 32], sizes = [2, 32], strides = [1, 1]} : vector<2x96xf32> to vector<2x32xf32>
    %534 = arith.addf %532, %533 : vector<2x32xf32>
    %535 = arith.negf %534 : vector<2x32xf32>
    %536 = math.exp %535 : vector<2x32xf32>
    %cst_159 = arith.constant 1.000000e+00 : f32
    %537 = vector.broadcast %cst_159 : f32 to vector<2x32xf32>
    %538 = arith.addf %537, %536 : vector<2x32xf32>
    %539 = arith.divf %537, %538 : vector<2x32xf32>
    %540 = vector.extract_strided_slice %520 {offsets = [0, 64], sizes = [2, 32], strides = [1, 1]} : vector<2x96xf32> to vector<2x32xf32>
    %541 = vector.extract_strided_slice %523 {offsets = [0, 64], sizes = [2, 32], strides = [1, 1]} : vector<2x96xf32> to vector<2x32xf32>
    %542 = arith.mulf %531, %541 : vector<2x32xf32>
    %543 = arith.addf %540, %542 : vector<2x32xf32>
    %544 = math.tanh %543 : vector<2x32xf32>
    %cst_160 = arith.constant 1.000000e+00 : f32
    %545 = vector.broadcast %cst_160 : f32 to vector<2x32xf32>
    %546 = arith.subf %545, %539 : vector<2x32xf32>
    %547 = arith.mulf %546, %544 : vector<2x32xf32>
    %548 = arith.mulf %539, %481 : vector<2x32xf32>
    %549 = arith.addf %547, %548 : vector<2x32xf32>
    %c0_161 = arith.constant 0 : index
    %c0_162 = arith.constant 0 : index
    %c0_163 = arith.constant 0 : index
    %550 = vector.load %arg10[%c0_161, %c0_162, %c0_163] : memref<8x2x32xf32, #tpu.memory_space<vmem>>, vector<1x2x32xf32>
    %551 = vector.shape_cast %550 : vector<1x2x32xf32> to vector<2x32xf32>
    %552 = vector.shape_cast %549 : vector<2x32xf32> to vector<1x2x32xf32>
    tpu.vector_store %arg10[%c0_161, %c0_162, %c0_163], %552 {strides = array<i32>} : memref<8x2x32xf32, #tpu.memory_space<vmem>>, vector<1x2x32xf32>,
    %c0_164 = arith.constant 0 : index
    %c0_165 = arith.constant 0 : index
    %553 = vector.load %arg13[%c0_164, %c0_165] : memref<2x32xf32, #tpu.memory_space<vmem>>, vector<2x32xf32>
    tpu.vector_store %arg13[%c0_164, %c0_165], %515 {strides = array<i32>} : memref<2x32xf32, #tpu.memory_space<vmem>>, vector<2x32xf32>,
    %c0_166 = arith.constant 0 : index
    %c0_167 = arith.constant 0 : index
    %554 = vector.load %arg14[%c0_166, %c0_167] : memref<2x32xf32, #tpu.memory_space<vmem>>, vector<2x32xf32>
    tpu.vector_store %arg14[%c0_166, %c0_167], %549 {strides = array<i32>} : memref<2x32xf32, #tpu.memory_space<vmem>>, vector<2x32xf32>,
    %c0_i32_168 = arith.constant 0 : i32
    %555 = arith.cmpi eq, %arg0, %c0_i32_168 : i32
    %556 = arith.extui %555 : i1 to i32
    %c0_i32_169 = arith.constant 0 : i32
    %557 = arith.cmpi ne, %556, %c0_i32_169 : i32
    scf.if %557 {
      %c0_170 = arith.constant 0 : index
      %c0_171 = arith.constant 0 : index
      %558 = vector.load %arg11[%c0_170, %c0_171] : memref<2x32xf32, #tpu.memory_space<vmem>>, vector<2x32xf32>
      tpu.vector_store %arg11[%c0_170, %c0_171], %515 {strides = array<i32>} : memref<2x32xf32, #tpu.memory_space<vmem>>, vector<2x32xf32>,
      %c0_172 = arith.constant 0 : index
      %c0_173 = arith.constant 0 : index
      %559 = vector.load %arg12[%c0_172, %c0_173] : memref<2x32xf32, #tpu.memory_space<vmem>>, vector<2x32xf32>
      tpu.vector_store %arg12[%c0_172, %c0_173], %549 {strides = array<i32>} : memref<2x32xf32, #tpu.memory_space<vmem>>, vector<2x32xf32>,
    } else {
    }
    return
  }
  func.func @transform_0(%arg0: i32) -> (i32, i32, i32) {
    %c0_i32 = arith.constant 0 : i32
    %c0_i32_0 = arith.constant 0 : i32
    %c0_i32_1 = arith.constant 0 : i32
    return %arg0, %c0_i32, %c0_i32_0 : i32, i32, i32
  }
  func.func @transform_1(%arg0: i32) -> (i32, i32, i32) {
    %c0_i32 = arith.constant 0 : i32
    %0 = arith.subi %c0_i32, %arg0 : i32
    %c0_i32_0 = arith.constant 0 : i32
    %c0_i32_1 = arith.constant 0 : i32
    %c0_i32_2 = arith.constant 0 : i32
    return %0, %c0_i32_0, %c0_i32_1 : i32, i32, i32
  }
  func.func @transform_2(%arg0: i32) -> (i32, i32) {
    %c0_i32 = arith.constant 0 : i32
    %c0_i32_0 = arith.constant 0 : i32
    %c0_i32_1 = arith.constant 0 : i32
    return %c0_i32, %c0_i32_0 : i32, i32
  }
  func.func @transform_3(%arg0: i32) -> (i32, i32) {
    %c0_i32 = arith.constant 0 : i32
    %c0_i32_0 = arith.constant 0 : i32
    %c0_i32_1 = arith.constant 0 : i32
    return %c0_i32, %c0_i32_0 : i32, i32
  }
  func.func @transform_4(%arg0: i32) -> (i32, i32) {
    %c0_i32 = arith.constant 0 : i32
    %c0_i32_0 = arith.constant 0 : i32
    %c0_i32_1 = arith.constant 0 : i32
    return %c0_i32, %c0_i32_0 : i32, i32
  }
  func.func @transform_5(%arg0: i32) -> (i32, i32) {
    %c0_i32 = arith.constant 0 : i32
    %c0_i32_0 = arith.constant 0 : i32
    %c0_i32_1 = arith.constant 0 : i32
    return %c0_i32, %c0_i32_0 : i32, i32
  }
  func.func @transform_6(%arg0: i32) -> (i32, i32) {
    %c0_i32 = arith.constant 0 : i32
    %c0_i32_0 = arith.constant 0 : i32
    %c0_i32_1 = arith.constant 0 : i32
    return %c0_i32, %c0_i32_0 : i32, i32
  }
  func.func @transform_7(%arg0: i32) -> (i32, i32) {
    %c0_i32 = arith.constant 0 : i32
    %c0_i32_0 = arith.constant 0 : i32
    %c0_i32_1 = arith.constant 0 : i32
    return %c0_i32, %c0_i32_0 : i32, i32
  }
  func.func @transform_8(%arg0: i32) -> (i32, i32, i32) {
    %c0_i32 = arith.constant 0 : i32
    %c0_i32_0 = arith.constant 0 : i32
    %c0_i32_1 = arith.constant 0 : i32
    return %arg0, %c0_i32, %c0_i32_0 : i32, i32, i32
  }
  func.func @transform_9(%arg0: i32) -> (i32, i32, i32) {
    %c0_i32 = arith.constant 0 : i32
    %0 = arith.subi %c0_i32, %arg0 : i32
    %c0_i32_0 = arith.constant 0 : i32
    %c0_i32_1 = arith.constant 0 : i32
    %c0_i32_2 = arith.constant 0 : i32
    return %0, %c0_i32_0, %c0_i32_1 : i32, i32, i32
  }
  func.func @transform_10(%arg0: i32) -> (i32, i32) {
    %c0_i32 = arith.constant 0 : i32
    %c0_i32_0 = arith.constant 0 : i32
    %c0_i32_1 = arith.constant 0 : i32
    return %c0_i32, %c0_i32_0 : i32, i32
  }
  func.func @transform_11(%arg0: i32) -> (i32, i32) {
    %c0_i32 = arith.constant 0 : i32
    %c0_i32_0 = arith.constant 0 : i32
    %c0_i32_1 = arith.constant 0 : i32
    return %c0_i32, %c0_i32_0 : i32, i32
  }
}

</mosaic_0001>

<bundles_post_ra>
// kernel: tpu_custom_call.1
= control target key start
LH: loop header
LB: loop body
LE: loop exit
PB: predicated region body
PF: predicated region fallthrough
CT: control target
= control target key end

     0   :  { %17 = vsyncpa [#allocation5], 0  ;;  %s3099_s0 = inlined_call_operand.hbm [shape: f32[8,2,96], index: 0, kind: input, shape index: {}]   ;;  %s3100_s1 = inlined_call_operand.hbm [shape: f32[8,2,96], index: 1, kind: input, shape index: {}]   ;;  %s3101_s2 = inlined_call_operand.vmem [shape: f32[2,32], index: 2, kind: input, shape index: {}]   ;;  %s3102_s3 = inlined_call_operand.vmem [shape: f32[2,32], index: 3, kind: input, shape index: {}]   ;;  %s3103_s4 = inlined_call_operand.hbm [shape: f32[32,96], index: 4, kind: input, shape index: {}]   ;;  %s3104_s5 = inlined_call_operand.hbm [shape: f32[32,96], index: 5, kind: input, shape index: {}]   ;;  %s3105_s6 = inlined_call_operand.vmem [shape: f32[1,96], index: 6, kind: input, shape index: {}]   ;;  %s3106_s7 = inlined_call_operand.vmem [shape: f32[1,96], index: 7, kind: input, shape index: {}]   ;;  %s3107_s8 = inlined_call_operand.hbm [shape: f32[8,2,32], index: 8, kind: output, shape index: {0}]   ;;  %s3108_s9 = inlined_call_operand.hbm [shape: f32[8,2,32], index: 9, kind: output, shape index: {1}]   ;;  %s3109_s10 = inlined_call_operand.hbm [shape: f32[2,32], index: 10, kind: output, shape index: {2}]   ;;  %s3110_s11 = inlined_call_operand.hbm [shape: f32[2,32], index: 11, kind: output, shape index: {3}]  }
   0x1   :  { %18 = vsyncpa [#allocation8], 0 }
   0x2   :  { %19 = vsyncpa [#allocation11], 0 }
   0x3   :  { %20 = vsyncpa [#allocation6], 0 }
   0x4   :  { %21 = vsyncpa [#allocation14], 0 }
   0x5   :  { %22 = vsyncpa [#allocation17], 0  ;;  %s2598_s17 = smov [#allocation7]   ;;  %s2599_s19 = smov [#allocation4]  }
   0x6   :  { %s44_s18 = sshll.u32 %s2598_s17, 4  ;;  %s28_s20 = sshll.u32 %s2599_s19, 4  ;;  %s45_s18 = int_to_ptr.vmem [resolvable:$true] %s44_s18  ;;  %s2675_s20 = int_to_ptr.vmem [resolvable:$true] %s28_s20 }
   0x7   :  { %s2410_s23 = scalar_lea.hbm %s3100_s1, 256 }
   0x8   :  { %p2411_p0 = scmp.ne.s32.totalorder %s3100_s1, %s2410_s23  ;;  %p2414_p1 = scmp.lt.u32.totalorder %s2410_s23, %s3100_s1 }
   0xa   :  { %p2416_p2 = pnand %p2414_p1, %p2411_p0 }
   0xc   :  { %2419 = shalt.err (!%p2416_p2)
}
   0xd   :  { %s2420_s28 = scalar_lea.vmem %s45_s18, 256  ;;  %p2425_p4 = scmp.lt.s32.totalorder %s45_s18, %s45_s18 }
   0xe   :  { %p2421_p3 = scmp.ne.s32.totalorder %s45_s18, %s2420_s28  ;;  %p2426_p5 = scmp.lt.s32.totalorder %s2420_s28, %s2420_s28 }
  0x10   :  { %p2427_p6 = por %p2426_p5, %p2425_p4 }
  0x12   :  { %p2428_p7 = pnand %p2427_p6, %p2421_p3 }
  0x14   :  { %2431 = shalt.err (!%p2428_p7)
}
  0x15   :  { %s2600_s29 = smov 32   ;;  %s2601_s30 = smov 2  }
  0x16   :  { %50 = dma.hbm_to_vmem [thread:$0]  %s3100_s1, 256, %s45_s18, [#allocation8], %s2600_s29, %s2600_s29, %s2601_s30  }
  0x17   :  { %s2432_s16 = scalar_lea.hbm %s3099_s0, 256 }
  0x18   :  { %p2433_p8 = scmp.ne.s32.totalorder %s3099_s0, %s2432_s16  ;;  %p2436_p9 = scmp.lt.u32.totalorder %s2432_s16, %s3099_s0 }
  0x1a   :  { %p2438_p10 = pnand %p2436_p9, %p2433_p8 }
  0x1c   :  { %2441 = shalt.err (!%p2438_p10)
}
  0x1d   :  { %s2442_s23 = scalar_lea.vmem %s2675_s20, 256  ;;  %p2447_p12 = scmp.lt.s32.totalorder %s2675_s20, %s2675_s20 }
  0x1e   :  { %p2443_p11 = scmp.ne.s32.totalorder %s2675_s20, %s2442_s23  ;;  %p2448_p13 = scmp.lt.s32.totalorder %s2442_s23, %s2442_s23 }
  0x20   :  { %p2449_p0 = por %p2448_p13, %p2447_p12 }
  0x22   :  { %p2450_p1 = pnand %p2449_p0, %p2443_p11 }
  0x24   :  { %2453 = shalt.err (!%p2450_p1)
}
  0x25   :  { %34 = dma.hbm_to_vmem [thread:$0]  %s3099_s0, 256, %s2675_s20, [#allocation5], %s2600_s29, %s2600_s29, %s2601_s30  }
  0x26   :  { %s2602_s24 = smov [#allocation9]   ;;  %s2454_s28 = scalar_lea.hbm %s3103_s4, 512 }
  0x27   :  { %s60_s25 = sshll.u32 %s2602_s24, 4  ;;  %p2455_p2 = scmp.ne.s32.totalorder %s3103_s4, %s2454_s28  ;;  %s61_s25 = int_to_ptr.vmem [resolvable:$true] %s60_s25 }
  0x28   :  { %p2458_p3 = scmp.lt.u32.totalorder %s2454_s28, %s3103_s4 }
  0x2a   :  { %p2460_p4 = pnand %p2458_p3, %p2455_p2 }
  0x2c   :  { %2463 = shalt.err (!%p2460_p4)
}
  0x2d   :  { %s2464_s16 = scalar_lea.vmem %s61_s25, 512  ;;  %p2469_p6 = scmp.lt.s32.totalorder %s61_s25, %s61_s25 }
  0x2e   :  { %p2465_p5 = scmp.ne.s32.totalorder %s61_s25, %s2464_s16  ;;  %p2470_p7 = scmp.lt.s32.totalorder %s2464_s16, %s2464_s16 }
  0x30   :  { %p2471_p8 = por %p2470_p7, %p2469_p6 }
  0x32   :  { %p2472_p9 = pnand %p2471_p8, %p2465_p5 }
  0x34   :  { %2475 = shalt.err (!%p2472_p9)
}
  0x35   :  { %s2603_s0 = smov 128   ;;  %s2604_s20 = smov 8  }
  0x36   :  { %66 = dma.hbm_to_vmem [thread:$0]  %s3103_s4, 512, %s61_s25, [#allocation8], %s2603_s0, %s2603_s0, %s2604_s20  }
  0x37   :  { %s2605_s21 = smov [#allocation10]   ;;  %s2476_s18 = scalar_lea.hbm %s3104_s5, 512 }
  0x38   :  { %s72_s22 = sshll.u32 %s2605_s21, 4  ;;  %p2477_p10 = scmp.ne.s32.totalorder %s3104_s5, %s2476_s18  ;;  %s73_s22 = int_to_ptr.vmem [resolvable:$true] %s72_s22 }
  0x39   :  { %p2480_p11 = scmp.lt.u32.totalorder %s2476_s18, %s3104_s5 }
  0x3b   :  { %p2482_p12 = pnand %p2480_p11, %p2477_p10 }
  0x3d   :  { %2485 = shalt.err (!%p2482_p12)
}
  0x3e   :  { %s2486_s12 = scalar_lea.vmem %s73_s22, 512  ;;  %p2491_p0 = scmp.lt.s32.totalorder %s73_s22, %s73_s22 }
  0x3f   :  { %p2487_p13 = scmp.ne.s32.totalorder %s73_s22, %s2486_s12  ;;  %p2492_p1 = scmp.lt.s32.totalorder %s2486_s12, %s2486_s12 }
  0x41   :  { %p2493_p2 = por %p2492_p1, %p2491_p0 }
  0x43   :  { %p2494_p3 = pnand %p2493_p2, %p2487_p13 }
  0x45   :  { %2497 = shalt.err (!%p2494_p3)
}
  0x46   :  { %78 = dma.hbm_to_vmem [thread:$0]  %s3104_s5, 512, %s73_s22, [#allocation11], %s2603_s0, %s2603_s0, %s2604_s20  }
  0x47   :  { %2586 = dma.done.wait [#allocation5], 256  }
  0x48   :  { %2587 = vsyncadd [#allocation5], 4294967040 }
  0x49   :  { %2588 = dma.done.wait [#allocation8], 768  }
  0x4a   :  { %2589 = vsyncadd [#allocation8], 4294966528 }
  0x4b   :  { %2590 = dma.done.wait [#allocation11], 512  }
  0x4c   :  { %2591 = vsyncadd [#allocation11], 4294966784  ;;  %v2606_v0 = vmov 0.0|0.0   ;;  %vm2607_vm0 = vmmov 0   ;;  %v2608_v1 = vmov 0.0   ;;  %v114_v2 = vld [vmem:[#allocation10] sm:$0xff] }
  0x4d   :  { %2207 = vmatprep.subr.bf16.mxu1 %v2606_v0  ;;  %2201 = vmatprep.subr.bf16.mxu0 %v2606_v0  ;;  %v115_v3 = vld [vmem:[#allocation10 + $0x8] sm:$0xff]  ;;  %v110_v4 = vld [vmem:[#allocation9] sm:$0xff]  ;;  %vm104_vm1 = vcmask 254976   ;;  %v116_v7 = vld [vmem:[#allocation10 + $0x10] sm:$0xff]  ;;  %vm127_vm2 = vcmask 261120   ;;  %s2609_s20 = smov 64  }
  0x4e   :  { %2044 = vmatprep.mubr.msk.f32.mxu1 %vm2607_vm0, %v2608_v1  ;;  %2033 = vmatprep.mubr.msk.f32.mxu0 %vm2607_vm0, %v2608_v1  ;;  %v2742_v5 = vpack.c.bf16 %v115_v3, %v114_v2  ;;  %v111_v6 = vld [vmem:[#allocation9 + $0x8] sm:$0xff]  ;;  %v117_v8 = vld [vmem:[#allocation10 + $0x18] sm:$0xff]  ;;  %v112_v10 = vld [vmem:[#allocation9 + $0x10] sm:$0xff]  ;;  %s2612_s19 = smov [#allocation16]   ;;  %s2613_s22 = smov [#allocation12]  }
  0x4f   :  { %v2744_v9 = vpack.c.bf16 %v111_v6, %v110_v4  ;;  %v113_v11 = vld [vmem:[#allocation9 + $0x18] sm:$0xff]  ;;  %v2750_v13 = vpack.c.bf16 %v117_v8, %v116_v7  ;;  %v120_v28 = vld [vmem:[#allocation4] sm:$0x3]  ;;  %s1885_s21 = sshll.u32 %s2612_s19, 4  ;;  %s1846_s23 = sshll.u32 %s2613_s22, 4  ;;  %s3018_s21 = int_to_ptr.vmem [resolvable:$true] %s1885_s21  ;;  %s3023_s23 = int_to_ptr.vmem [resolvable:$true] %s1846_s23 }
  0x50   :  { %v106_v12 = vld [vmem:[%s3102_s3] sm:$0x3]  ;;  %2209 = vmatpush3.bf16.msra.mxu1 %v2742_v5  ;;  %v2758_v15 = vpack.c.bf16 %v113_v11, %v112_v10  ;;  %v237_v26 = vld [vmem:[#allocation7 + $0xe] sm:$0x3]  ;;  %v353_v10 = vld [vmem:[#allocation4 + $0x2] sm:$0x3] }
  0x51   :  { %107 = vst.msk [vmem:[#allocation3] sm:$0x3] %vm104_vm1, %v106_v12  ;;  %v103_v14 = vld [vmem:[%s3101_s2] sm:$0x3]  ;;  %2203 = vmatpush3.bf16.msra.mxu0 %v2744_v9  ;;  %2210 = vmatprep.subr.bf16.mxu1 %v2606_v0  ;;  %s2614_s1 = smov [#allocation15]  }
  0x52   :  { %105 = vst.msk [vmem:[#allocation2] sm:$0x3] %vm104_vm1, %v103_v14  ;;  %2204 = vmatprep.subr.bf16.mxu0 %v2606_v0  ;;  %v2783_v18 = vld [vmem:[%s3106_s7] ss:$0 sm:$0xff]  ;;  %s2611_s7 = smov [#allocation13]   ;;  %s1875_s18 = sshll.u32 %s2614_s1, 4  ;;  %s3057_s18 = int_to_ptr.vmem [resolvable:$true] %s1875_s18 }
  0x53   :  { %v2788_v20 = vld [vmem:[%s3105_s6] ss:$0 sm:$0xff]  ;;  %s2610_s6 = smov 96   ;;  %s1862_s17 = sshll.u32 %s2611_s7, 4  ;;  %s1863_s17 = int_to_ptr.vmem [resolvable:$true] %s1862_s17 }
  0x54   :  { %2212 = vmatpush3.bf16.msra.mxu1 %v2750_v13  ;;  %v459_v7 = vld [vmem:[#allocation7 + $0xc] sm:$0x3]  ;;  %s2498_s24 = scalar_lea.vmem %s1863_s17, 256  ;;  %p2503_p5 = scmp.lt.s32.totalorder %s1863_s17, %s1863_s17 }
  0x55   :  { %2206 = vmatpush3.bf16.msra.mxu0 %v2758_v15  ;;  %2219 = vmatprep.subr.bf16.mxu1 %v2606_v0  ;;  %p2499_p4 = scmp.ne.s32.totalorder %s1863_s17, %s2498_s24  ;;  %p2504_p6 = scmp.lt.s32.totalorder %s2498_s24, %s2498_s24 }
  0x56   :  { %2213 = vmatprep.subr.bf16.mxu0 %v2606_v0 }
  0x57   :  { %p2505_p7 = por %p2504_p6, %p2503_p5 }
  0x58   :  { %v109_v16 = vld [vmem:[#allocation3] sm:$0x3] }
  0x59   :  { %2045 = vmatmul.mubr.msk.f32.vlgmr.msra.gmra.mrb[0].mxu1 %vm127_vm2, %v109_v16  ;;  %v108_v17 = vld [vmem:[#allocation2] sm:$0x3]  ;;  %p2506_p8 = pnand %p2505_p7, %p2499_p4 }
  0x5a   :  { %2034 = vmatmul.mubr.msk.f32.vlgmr.msra.gmra.mrb[0].mxu0 %vm127_vm2, %v108_v17  ;;  %2221 = vmatpush3.bf16.msra.mxu1 %v2742_v5 }
  0x5b   :  { %2222 = vmatprep.subr.bf16.mxu1 %v2606_v0  ;;  %2215 = vmatpush3.bf16.msra.mxu0 %v2744_v9 }
  0x5c   :  { %2066 = vmatprep.mubr.msk.f32.mxu1 %vm2607_vm0, %v2608_v1  ;;  %2216 = vmatprep.subr.bf16.mxu0 %v2606_v0 }
  0x5d   :  { %2055 = vmatprep.mubr.msk.f32.mxu0 %vm2607_vm0, %v2608_v1 }
  0x5e   :  { %2224 = vmatpush3.bf16.msra.mxu1 %v2750_v13 }
  0x5f   :  { %2218 = vmatpush3.bf16.msra.mxu0 %v2758_v15  ;;  %2231 = vmatprep.subr.bf16.mxu1 %v2606_v0 }
  0x60   :  { %2225 = vmatprep.subr.bf16.mxu0 %v2606_v0 }
 0x12c   :  { %v313_v19 = vpop.f32.mrb[0].mxu1 }
 0x12d   :  { %v314_v21 = vadd.f32 %v2783_v18, %v313_v19  ;;  %v2046_v22 = vpop.f32.mrb[1].mxu1  ;;  %v197_v23 = vpop.f32.mrb[0].mxu0 }
 0x12e   :  { %v2035_v24 = vpop.f32.mrb[1].mxu0  ;;  %v198_v25 = vadd.f32 %v2788_v20, %v197_v23 }
 0x12f   :  { %325 = vrot.lane.b32.xlu0 %v314_v21, %s2609_s20  ;;  %v317_v27 = vadd.f32 %v314_v21, %v237_v26 }
 0x130   :  { %v201_v30 = vadd.f32 %v198_v25, %v120_v28 }
 0x131   :  { %v1916_v29 = vmul.f32 -1.442695, %v317_v27 }
 0x132   :  { %v1913_v31 = vmul.f32 -1.442695, %v201_v30 }
 0x133   :  { %209 = vrot.lane.b32.xlu0 %v198_v25, %s2609_s20  ;;  %2314 = vpow2.f32 %v1916_v29 }
 0x134   :  { %2316 = vpow2.f32 %v1913_v31 }
 0x13d   :  { %v2315_v32 = vpop.eup %2314 }
 0x13e   :  { %v321_v33 = vadd.f32 1.0, %v2315_v32  ;;  %v2317_v34 = vpop.eup %2316 }
 0x13f   :  { %v205_v35 = vadd.f32 1.0, %v2317_v34 }
 0x140   :  { %2318 = vrcp.f32 %v321_v33 }
 0x141   :  { %2320 = vrcp.f32 %v205_v35 }
 0x14a   :  { %v2319_v36 = vpop.eup %2318 }
 0x14b   :  { %v2321_v39 = vpop.eup %2320  ;;  %v335_v49 = vsub.f32 1.0, %v2319_v36 }
 0x14c   :  { %v219_v55 = vsub.f32 1.0, %v2321_v39 }
 0x1a1   :  { %v326_v37 = vpop.permute.xlu0 %325 }
 0x1a2   :  { %v328_v38 = vmul.f32 %v2319_v36, %v326_v37 }
 0x1a4   :  { %330 = vrot.lane.b32.xlu1 %v328_v38, %s2609_s20 }
 0x1a5   :  { %v210_v40 = vpop.permute.xlu0 %209 }
 0x1a6   :  { %v212_v41 = vmul.f32 %v2321_v39, %v210_v40 }
 0x1a8   :  { %214 = vrot.lane.b32.xlu1 %v212_v41, %s2609_s20 }
 0x1ac   :  { %341 = vrot.lane.b32.xlu1 %v109_v16, %s2600_s29 }
 0x1b0   :  { %225 = vrot.lane.b32.xlu1 %v108_v17, %s2600_s29 }
 0x216   :  { %v331_v42 = vpop.permute.xlu1 %330 }
 0x217   :  { %v333_v43 = vadd.f32 %v331_v42, %v237_v26 }
 0x219   :  { %2322 = vtanh.f32 %v333_v43 }
 0x21a   :  { %v215_v44 = vpop.permute.xlu1 %214 }
 0x21b   :  { %v217_v45 = vadd.f32 %v215_v44, %v120_v28 }
 0x21d   :  { %2324 = vtanh.f32 %v217_v45 }
 0x21e   :  { %v342_v48 = vpop.permute.xlu1 %341 }
 0x21f   :  { %v344_v51 = vmul.f32 %v2319_v36, %v342_v48 }
 0x222   :  { %v226_v53 = vpop.permute.xlu1 %225 }
 0x223   :  { %v2323_v46 = vpop.eup %2322  ;;  %v228_v57 = vmul.f32 %v2321_v39, %v226_v53 }
 0x224   :  { %337 = vrot.lane.b32.xlu0 %v2323_v46, %s2610_s6 }
 0x227   :  { %v2325_v47 = vpop.eup %2324 }
 0x228   :  { %221 = vrot.lane.b32.xlu0 %v2325_v47, %s2610_s6 }
 0x296   :  { %v338_v50 = vpop.permute.xlu0 %337 }
 0x297   :  { %v340_v52 = vmul.f32 %v338_v50, %v335_v49 }
 0x299   :  { %v2800_v54 = vadd.f32 %v344_v51, %v340_v52  ;;  %v671_v52 = vld [vmem:[#allocation7 + $0xa] sm:$0x3] }
 0x29a   :  { %v222_v56 = vpop.permute.xlu0 %221 }
 0x29b   :  { %v224_v58 = vmul.f32 %v222_v56, %v219_v55  ;;  %347 = vrot.lane.b32.xlu0 %v2800_v54, %s2610_s6 }
 0x29d   :  { %v2804_v59 = vadd.f32 %v228_v57, %v224_v58 }
 0x29f   :  { %231 = vrot.lane.b32.xlu1 %v2804_v59, %s2610_s6 }
 0x30d   :  { %v348_v60 = vpop.permute.xlu0 %347 }
 0x30e   :  { %351 = vst.msk [vmem:[#allocation13 + $0xe] sm:$0x3] %vm104_vm1, %v348_v60  ;;  %2067 = vmatmul.mubr.msk.f32.vlgmr.msra.gmra.mrb[2].mxu1 %vm127_vm2, %v348_v60 }
 0x30f   :  { %2233 = vmatpush3.bf16.msra.mxu1 %v2742_v5  ;;  %2088 = vmatprep.mubr.msk.f32.mxu1 %vm2607_vm0, %v2608_v1 }
 0x310   :  { %2234 = vmatprep.subr.bf16.mxu1 %v2606_v0 }
 0x311   :  { %v232_v61 = vpop.permute.xlu1 %231 }
 0x312   :  { %235 = vst.msk [vmem:[#allocation12] sm:$0x3] %vm104_vm1, %v232_v61  ;;  %2056 = vmatmul.mubr.msk.f32.vlgmr.msra.gmra.mrb[2].mxu0 %vm127_vm2, %v232_v61 }
 0x313   :  { %2227 = vmatpush3.bf16.msra.mxu0 %v2744_v9  ;;  %2236 = vmatpush3.bf16.msra.mxu1 %v2750_v13 }
 0x314   :  { %2228 = vmatprep.subr.bf16.mxu0 %v2606_v0  ;;  %2077 = vmatprep.mubr.msk.f32.mxu0 %vm2607_vm0, %v2608_v1 }
 0x315   :  { %2243 = vmatprep.subr.bf16.mxu1 %v2606_v0 }
 0x317   :  { %2230 = vmatpush3.bf16.msra.mxu0 %v2758_v15 }
 0x318   :  { %2237 = vmatprep.subr.bf16.mxu0 %v2606_v0 }
 0x3e1   :  { %v528_v62 = vpop.f32.mrb[2].mxu1 }
 0x3e2   :  { %v529_v63 = vadd.f32 %v2783_v18, %v528_v62  ;;  %v2068_v2 = vpop.f32.mrb[3].mxu1 }
 0x3e4   :  { %540 = vrot.lane.b32.xlu0 %v529_v63, %s2609_s20  ;;  %v532_v8 = vadd.f32 %v529_v63, %v459_v7 }
 0x3e5   :  { %v422_v3 = vpop.f32.mrb[2].mxu0 }
 0x3e6   :  { %v423_v4 = vadd.f32 %v2788_v20, %v422_v3  ;;  %v2057_v6 = vpop.f32.mrb[3].mxu0  ;;  %v1920_v11 = vmul.f32 -1.442695, %v532_v8 }
 0x3e8   :  { %434 = vrot.lane.b32.xlu1 %v423_v4, %s2609_s20  ;;  %v426_v12 = vadd.f32 %v423_v4, %v353_v10  ;;  %2326 = vpow2.f32 %v1920_v11 }
 0x3ea   :  { %v1918_v14 = vmul.f32 -1.442695, %v426_v12 }
 0x3ec   :  { %2328 = vpow2.f32 %v1918_v14 }
 0x3f2   :  { %v2327_v16 = vpop.eup %2326 }
 0x3f3   :  { %v536_v17 = vadd.f32 1.0, %v2327_v16 }
 0x3f5   :  { %2330 = vrcp.f32 %v536_v17 }
 0x3f6   :  { %v2329_v19 = vpop.eup %2328 }
 0x3f7   :  { %v430_v21 = vadd.f32 1.0, %v2329_v19 }
 0x3f9   :  { %2332 = vrcp.f32 %v430_v21 }
 0x3ff   :  { %v2331_v22 = vpop.eup %2330 }
 0x400   :  { %v550_v34 = vsub.f32 1.0, %v2331_v22  ;;  %v556_v36 = vmul.f32 %v2331_v22, %v2800_v54  ;;  %v565_v54 = vld [vmem:[#allocation4 + $0x4] sm:$0x3] }
 0x403   :  { %v2333_v25 = vpop.eup %2332 }
 0x404   :  { %v444_v39 = vsub.f32 1.0, %v2333_v25  ;;  %v450_v41 = vmul.f32 %v2333_v25, %v2804_v59 }
 0x456   :  { %v541_v23 = vpop.permute.xlu0 %540 }
 0x457   :  { %v543_v24 = vmul.f32 %v2331_v22, %v541_v23 }
 0x459   :  { %545 = vrot.lane.b32.xlu0 %v543_v24, %s2609_s20 }
 0x45a   :  { %v435_v26 = vpop.permute.xlu1 %434 }
 0x45b   :  { %v437_v27 = vmul.f32 %v2333_v25, %v435_v26 }
 0x45d   :  { %439 = vrot.lane.b32.xlu1 %v437_v27, %s2609_s20 }
 0x4cb   :  { %v546_v28 = vpop.permute.xlu0 %545 }
 0x4cc   :  { %v548_v29 = vadd.f32 %v546_v28, %v459_v7 }
 0x4ce   :  { %2334 = vtanh.f32 %v548_v29 }
 0x4cf   :  { %v440_v30 = vpop.permute.xlu1 %439 }
 0x4d0   :  { %v442_v31 = vadd.f32 %v440_v30, %v353_v10 }
 0x4d2   :  { %2336 = vtanh.f32 %v442_v31 }
 0x4d8   :  { %v2335_v32 = vpop.eup %2334 }
 0x4d9   :  { %552 = vrot.lane.b32.xlu0 %v2335_v32, %s2610_s6 }
 0x4dc   :  { %v2337_v33 = vpop.eup %2336 }
 0x4dd   :  { %446 = vrot.lane.b32.xlu1 %v2337_v33, %s2610_s6 }
 0x54b   :  { %v553_v35 = vpop.permute.xlu0 %552 }
 0x54c   :  { %v555_v37 = vmul.f32 %v553_v35, %v550_v34 }
 0x54e   :  { %v2833_v38 = vadd.f32 %v556_v36, %v555_v37  ;;  %v883_v36 = vld [vmem:[#allocation7 + $0x8] sm:$0x3] }
 0x54f   :  { %v447_v40 = vpop.permute.xlu1 %446 }
 0x550   :  { %v449_v42 = vmul.f32 %v447_v40, %v444_v39  ;;  %559 = vrot.lane.b32.xlu0 %v2833_v38, %s2610_s6 }
 0x552   :  { %v2838_v43 = vadd.f32 %v450_v41, %v449_v42 }
 0x554   :  { %453 = vrot.lane.b32.xlu1 %v2838_v43, %s2610_s6 }
 0x5c2   :  { %v560_v44 = vpop.permute.xlu0 %559 }
 0x5c3   :  { %563 = vst.msk [vmem:[#allocation13 + $0xc] sm:$0x3] %vm104_vm1, %v560_v44  ;;  %2089 = vmatmul.mubr.msk.f32.vlgmr.msra.gmra.mrb[4].mxu1 %vm127_vm2, %v560_v44 }
 0x5c4   :  { %2245 = vmatpush3.bf16.msra.mxu1 %v2742_v5  ;;  %2110 = vmatprep.mubr.msk.f32.mxu1 %vm2607_vm0, %v2608_v1 }
 0x5c5   :  { %2246 = vmatprep.subr.bf16.mxu1 %v2606_v0 }
 0x5c6   :  { %v454_v45 = vpop.permute.xlu1 %453 }
 0x5c7   :  { %457 = vst.msk [vmem:[#allocation12 + $0x2] sm:$0x3] %vm104_vm1, %v454_v45  ;;  %2078 = vmatmul.mubr.msk.f32.vlgmr.msra.gmra.mrb[4].mxu0 %vm127_vm2, %v454_v45 }
 0x5c8   :  { %2239 = vmatpush3.bf16.msra.mxu0 %v2744_v9  ;;  %2248 = vmatpush3.bf16.msra.mxu1 %v2750_v13 }
 0x5c9   :  { %2240 = vmatprep.subr.bf16.mxu0 %v2606_v0  ;;  %2099 = vmatprep.mubr.msk.f32.mxu0 %vm2607_vm0, %v2608_v1 }
 0x5ca   :  { %2255 = vmatprep.subr.bf16.mxu1 %v2606_v0 }
 0x5cc   :  { %2242 = vmatpush3.bf16.msra.mxu0 %v2758_v15 }
 0x5cd   :  { %2249 = vmatprep.subr.bf16.mxu0 %v2606_v0 }
 0x696   :  { %v740_v46 = vpop.f32.mrb[4].mxu1 }
 0x697   :  { %v741_v47 = vadd.f32 %v2783_v18, %v740_v46  ;;  %v2090_v48 = vpop.f32.mrb[5].mxu1 }
 0x699   :  { %752 = vrot.lane.b32.xlu0 %v741_v47, %s2609_s20  ;;  %v744_v53 = vadd.f32 %v741_v47, %v671_v52 }
 0x69a   :  { %v634_v49 = vpop.f32.mrb[4].mxu0 }
 0x69b   :  { %v635_v50 = vadd.f32 %v2788_v20, %v634_v49  ;;  %v2079_v51 = vpop.f32.mrb[5].mxu0  ;;  %v1924_v55 = vmul.f32 -1.442695, %v744_v53 }
 0x69d   :  { %646 = vrot.lane.b32.xlu1 %v635_v50, %s2609_s20  ;;  %v638_v56 = vadd.f32 %v635_v50, %v565_v54  ;;  %2338 = vpow2.f32 %v1924_v55 }
 0x69f   :  { %v1922_v57 = vmul.f32 -1.442695, %v638_v56 }
 0x6a1   :  { %2340 = vpow2.f32 %v1922_v57 }
 0x6a7   :  { %v2339_v58 = vpop.eup %2338 }
 0x6a8   :  { %v748_v59 = vadd.f32 1.0, %v2339_v58 }
 0x6aa   :  { %2342 = vrcp.f32 %v748_v59 }
 0x6ab   :  { %v2341_v60 = vpop.eup %2340 }
 0x6ac   :  { %v642_v61 = vadd.f32 1.0, %v2341_v60 }
 0x6ae   :  { %2344 = vrcp.f32 %v642_v61 }
 0x6b4   :  { %v2343_v62 = vpop.eup %2342 }
 0x6b5   :  { %v762_v16 = vsub.f32 1.0, %v2343_v62  ;;  %v768_v19 = vmul.f32 %v2343_v62, %v2833_v38  ;;  %v777_v38 = vld [vmem:[#allocation4 + $0x6] sm:$0x3] }
 0x6b8   :  { %v2345_v3 = vpop.eup %2344 }
 0x6b9   :  { %v656_v23 = vsub.f32 1.0, %v2345_v3  ;;  %v662_v25 = vmul.f32 %v2345_v3, %v2838_v43 }
 0x70b   :  { %v753_v63 = vpop.permute.xlu0 %752 }
 0x70c   :  { %v755_v2 = vmul.f32 %v2343_v62, %v753_v63 }
 0x70e   :  { %757 = vrot.lane.b32.xlu0 %v755_v2, %s2609_s20 }
 0x70f   :  { %v647_v4 = vpop.permute.xlu1 %646 }
 0x710   :  { %v649_v6 = vmul.f32 %v2345_v3, %v647_v4 }
 0x712   :  { %651 = vrot.lane.b32.xlu1 %v649_v6, %s2609_s20 }
 0x780   :  { %v758_v7 = vpop.permute.xlu0 %757 }
 0x781   :  { %v760_v8 = vadd.f32 %v758_v7, %v671_v52 }
 0x783   :  { %2346 = vtanh.f32 %v760_v8 }
 0x784   :  { %v652_v10 = vpop.permute.xlu1 %651 }
 0x785   :  { %v654_v11 = vadd.f32 %v652_v10, %v565_v54 }
 0x787   :  { %2348 = vtanh.f32 %v654_v11 }
 0x78d   :  { %v2347_v12 = vpop.eup %2346 }
 0x78e   :  { %764 = vrot.lane.b32.xlu0 %v2347_v12, %s2610_s6 }
 0x791   :  { %v2349_v14 = vpop.eup %2348 }
 0x792   :  { %658 = vrot.lane.b32.xlu1 %v2349_v14, %s2610_s6 }
 0x800   :  { %v765_v17 = vpop.permute.xlu0 %764 }
 0x801   :  { %v767_v21 = vmul.f32 %v765_v17, %v762_v16 }
 0x803   :  { %v2867_v22 = vadd.f32 %v768_v19, %v767_v21  ;;  %v1095_v19 = vld [vmem:[#allocation7 + $0x6] sm:$0x3] }
 0x804   :  { %v659_v24 = vpop.permute.xlu1 %658 }
 0x805   :  { %v661_v26 = vmul.f32 %v659_v24, %v656_v23  ;;  %771 = vrot.lane.b32.xlu0 %v2867_v22, %s2610_s6 }
 0x807   :  { %v2872_v27 = vadd.f32 %v662_v25, %v661_v26 }
 0x809   :  { %665 = vrot.lane.b32.xlu1 %v2872_v27, %s2610_s6 }
 0x877   :  { %v772_v28 = vpop.permute.xlu0 %771 }
 0x878   :  { %775 = vst.msk [vmem:[#allocation13 + $0xa] sm:$0x3] %vm104_vm1, %v772_v28  ;;  %2111 = vmatmul.mubr.msk.f32.vlgmr.msra.gmra.mrb[6].mxu1 %vm127_vm2, %v772_v28 }
 0x879   :  { %2257 = vmatpush3.bf16.msra.mxu1 %v2742_v5  ;;  %2132 = vmatprep.mubr.msk.f32.mxu1 %vm2607_vm0, %v2608_v1 }
 0x87a   :  { %2258 = vmatprep.subr.bf16.mxu1 %v2606_v0 }
 0x87b   :  { %v666_v29 = vpop.permute.xlu1 %665 }
 0x87c   :  { %669 = vst.msk [vmem:[#allocation12 + $0x4] sm:$0x3] %vm104_vm1, %v666_v29  ;;  %2100 = vmatmul.mubr.msk.f32.vlgmr.msra.gmra.mrb[6].mxu0 %vm127_vm2, %v666_v29 }
 0x87d   :  { %2251 = vmatpush3.bf16.msra.mxu0 %v2744_v9  ;;  %2260 = vmatpush3.bf16.msra.mxu1 %v2750_v13 }
 0x87e   :  { %2252 = vmatprep.subr.bf16.mxu0 %v2606_v0  ;;  %2121 = vmatprep.mubr.msk.f32.mxu0 %vm2607_vm0, %v2608_v1 }
 0x87f   :  { %2267 = vmatprep.subr.bf16.mxu1 %v2606_v0 }
 0x881   :  { %2254 = vmatpush3.bf16.msra.mxu0 %v2758_v15 }
 0x882   :  { %2261 = vmatprep.subr.bf16.mxu0 %v2606_v0 }
 0x94b   :  { %v952_v30 = vpop.f32.mrb[6].mxu1 }
 0x94c   :  { %v953_v31 = vadd.f32 %v2783_v18, %v952_v30  ;;  %v2112_v32 = vpop.f32.mrb[7].mxu1 }
 0x94e   :  { %964 = vrot.lane.b32.xlu0 %v953_v31, %s2609_s20  ;;  %v956_v37 = vadd.f32 %v953_v31, %v883_v36 }
 0x94f   :  { %v846_v33 = vpop.f32.mrb[6].mxu0 }
 0x950   :  { %v847_v34 = vadd.f32 %v2788_v20, %v846_v33  ;;  %v2101_v35 = vpop.f32.mrb[7].mxu0  ;;  %v1928_v39 = vmul.f32 -1.442695, %v956_v37 }
 0x952   :  { %858 = vrot.lane.b32.xlu1 %v847_v34, %s2609_s20  ;;  %v850_v40 = vadd.f32 %v847_v34, %v777_v38  ;;  %2350 = vpow2.f32 %v1928_v39 }
 0x954   :  { %v1926_v41 = vmul.f32 -1.442695, %v850_v40 }
 0x956   :  { %2352 = vpow2.f32 %v1926_v41 }
 0x95c   :  { %v2351_v42 = vpop.eup %2350 }
 0x95d   :  { %v960_v43 = vadd.f32 1.0, %v2351_v42 }
 0x95f   :  { %2354 = vrcp.f32 %v960_v43 }
 0x960   :  { %v2353_v44 = vpop.eup %2352 }
 0x961   :  { %v854_v45 = vadd.f32 1.0, %v2353_v44 }
 0x963   :  { %2356 = vrcp.f32 %v854_v45 }
 0x969   :  { %v2355_v46 = vpop.eup %2354 }
 0x96a   :  { %v974_v58 = vsub.f32 1.0, %v2355_v46  ;;  %v980_v60 = vmul.f32 %v2355_v46, %v2867_v22  ;;  %v989_v22 = vld [vmem:[#allocation4 + $0x8] sm:$0x3] }
 0x96d   :  { %v2357_v49 = vpop.eup %2356 }
 0x96e   :  { %v868_v63 = vsub.f32 1.0, %v2357_v49  ;;  %v874_v3 = vmul.f32 %v2357_v49, %v2872_v27 }
 0x9c0   :  { %v965_v47 = vpop.permute.xlu0 %964 }
 0x9c1   :  { %v967_v48 = vmul.f32 %v2355_v46, %v965_v47 }
 0x9c3   :  { %969 = vrot.lane.b32.xlu0 %v967_v48, %s2609_s20 }
 0x9c4   :  { %v859_v50 = vpop.permute.xlu1 %858 }
 0x9c5   :  { %v861_v51 = vmul.f32 %v2357_v49, %v859_v50 }
 0x9c7   :  { %863 = vrot.lane.b32.xlu1 %v861_v51, %s2609_s20 }
 0xa35   :  { %v970_v52 = vpop.permute.xlu0 %969 }
 0xa36   :  { %v972_v53 = vadd.f32 %v970_v52, %v883_v36 }
 0xa38   :  { %2358 = vtanh.f32 %v972_v53 }
 0xa39   :  { %v864_v54 = vpop.permute.xlu1 %863 }
 0xa3a   :  { %v866_v55 = vadd.f32 %v864_v54, %v777_v38 }
 0xa3c   :  { %2360 = vtanh.f32 %v866_v55 }
 0xa42   :  { %v2359_v56 = vpop.eup %2358 }
 0xa43   :  { %976 = vrot.lane.b32.xlu0 %v2359_v56, %s2610_s6 }
 0xa46   :  { %v2361_v57 = vpop.eup %2360 }
 0xa47   :  { %870 = vrot.lane.b32.xlu1 %v2361_v57, %s2610_s6 }
 0xab5   :  { %v977_v59 = vpop.permute.xlu0 %976 }
 0xab6   :  { %v979_v61 = vmul.f32 %v977_v59, %v974_v58 }
 0xab8   :  { %v2901_v62 = vadd.f32 %v980_v60, %v979_v61  ;;  %v1307_v60 = vld [vmem:[#allocation7 + $0x4] sm:$0x3] }
 0xab9   :  { %v871_v2 = vpop.permute.xlu1 %870 }
 0xaba   :  { %v873_v4 = vmul.f32 %v871_v2, %v868_v63  ;;  %983 = vrot.lane.b32.xlu0 %v2901_v62, %s2610_s6 }
 0xabc   :  { %v2906_v6 = vadd.f32 %v874_v3, %v873_v4 }
 0xabe   :  { %877 = vrot.lane.b32.xlu1 %v2906_v6, %s2610_s6 }
 0xb2c   :  { %v984_v7 = vpop.permute.xlu0 %983 }
 0xb2d   :  { %987 = vst.msk [vmem:[#allocation13 + $0x8] sm:$0x3] %vm104_vm1, %v984_v7  ;;  %2133 = vmatmul.mubr.msk.f32.vlgmr.msra.gmra.mrb[8].mxu1 %vm127_vm2, %v984_v7 }
 0xb2e   :  { %2269 = vmatpush3.bf16.msra.mxu1 %v2742_v5  ;;  %2154 = vmatprep.mubr.msk.f32.mxu1 %vm2607_vm0, %v2608_v1 }
 0xb2f   :  { %2270 = vmatprep.subr.bf16.mxu1 %v2606_v0 }
 0xb30   :  { %v878_v8 = vpop.permute.xlu1 %877 }
 0xb31   :  { %881 = vst.msk [vmem:[#allocation12 + $0x6] sm:$0x3] %vm104_vm1, %v878_v8  ;;  %2122 = vmatmul.mubr.msk.f32.vlgmr.msra.gmra.mrb[8].mxu0 %vm127_vm2, %v878_v8 }
 0xb32   :  { %2263 = vmatpush3.bf16.msra.mxu0 %v2744_v9  ;;  %2272 = vmatpush3.bf16.msra.mxu1 %v2750_v13 }
 0xb33   :  { %2264 = vmatprep.subr.bf16.mxu0 %v2606_v0  ;;  %2143 = vmatprep.mubr.msk.f32.mxu0 %vm2607_vm0, %v2608_v1 }
 0xb34   :  { %2279 = vmatprep.subr.bf16.mxu1 %v2606_v0 }
 0xb36   :  { %2266 = vmatpush3.bf16.msra.mxu0 %v2758_v15 }
 0xb37   :  { %2273 = vmatprep.subr.bf16.mxu0 %v2606_v0 }
 0xc00   :  { %v1164_v10 = vpop.f32.mrb[8].mxu1 }
 0xc01   :  { %v1165_v11 = vadd.f32 %v2783_v18, %v1164_v10  ;;  %v2134_v12 = vpop.f32.mrb[9].mxu1 }
 0xc03   :  { %1176 = vrot.lane.b32.xlu0 %v1165_v11, %s2609_s20  ;;  %v1168_v21 = vadd.f32 %v1165_v11, %v1095_v19 }
 0xc04   :  { %v1058_v14 = vpop.f32.mrb[8].mxu0 }
 0xc05   :  { %v1059_v16 = vadd.f32 %v2788_v20, %v1058_v14  ;;  %v2123_v17 = vpop.f32.mrb[9].mxu0  ;;  %v1932_v23 = vmul.f32 -1.442695, %v1168_v21 }
 0xc07   :  { %1070 = vrot.lane.b32.xlu1 %v1059_v16, %s2609_s20  ;;  %v1062_v24 = vadd.f32 %v1059_v16, %v989_v22  ;;  %2362 = vpow2.f32 %v1932_v23 }
 0xc09   :  { %v1930_v25 = vmul.f32 -1.442695, %v1062_v24 }
 0xc0b   :  { %2364 = vpow2.f32 %v1930_v25 }
 0xc11   :  { %v2363_v26 = vpop.eup %2362 }
 0xc12   :  { %v1172_v27 = vadd.f32 1.0, %v2363_v26 }
 0xc14   :  { %2366 = vrcp.f32 %v1172_v27 }
 0xc15   :  { %v2365_v28 = vpop.eup %2364 }
 0xc16   :  { %v1066_v29 = vadd.f32 1.0, %v2365_v28 }
 0xc18   :  { %2368 = vrcp.f32 %v1066_v29 }
 0xc1e   :  { %v2367_v30 = vpop.eup %2366 }
 0xc1f   :  { %v1186_v42 = vsub.f32 1.0, %v2367_v30  ;;  %v1192_v44 = vmul.f32 %v2367_v30, %v2901_v62  ;;  %v1201_v62 = vld [vmem:[#allocation4 + $0xa] sm:$0x3] }
 0xc22   :  { %v2369_v33 = vpop.eup %2368 }
 0xc23   :  { %v1080_v47 = vsub.f32 1.0, %v2369_v33  ;;  %v1086_v49 = vmul.f32 %v2369_v33, %v2906_v6 }
 0xc75   :  { %v1177_v31 = vpop.permute.xlu0 %1176 }
 0xc76   :  { %v1179_v32 = vmul.f32 %v2367_v30, %v1177_v31 }
 0xc78   :  { %1181 = vrot.lane.b32.xlu0 %v1179_v32, %s2609_s20 }
 0xc79   :  { %v1071_v34 = vpop.permute.xlu1 %1070 }
 0xc7a   :  { %v1073_v35 = vmul.f32 %v2369_v33, %v1071_v34 }
 0xc7c   :  { %1075 = vrot.lane.b32.xlu1 %v1073_v35, %s2609_s20 }
 0xcea   :  { %v1182_v36 = vpop.permute.xlu0 %1181 }
 0xceb   :  { %v1184_v37 = vadd.f32 %v1182_v36, %v1095_v19 }
 0xced   :  { %2370 = vtanh.f32 %v1184_v37 }
 0xcee   :  { %v1076_v38 = vpop.permute.xlu1 %1075 }
 0xcef   :  { %v1078_v39 = vadd.f32 %v1076_v38, %v989_v22 }
 0xcf1   :  { %2372 = vtanh.f32 %v1078_v39 }
 0xcf7   :  { %v2371_v40 = vpop.eup %2370 }
 0xcf8   :  { %1188 = vrot.lane.b32.xlu0 %v2371_v40, %s2610_s6 }
 0xcfb   :  { %v2373_v41 = vpop.eup %2372 }
 0xcfc   :  { %1082 = vrot.lane.b32.xlu1 %v2373_v41, %s2610_s6 }
 0xd6a   :  { %v1189_v43 = vpop.permute.xlu0 %1188 }
 0xd6b   :  { %v1191_v45 = vmul.f32 %v1189_v43, %v1186_v42 }
 0xd6d   :  { %v2935_v46 = vadd.f32 %v1192_v44, %v1191_v45 }
 0xd6e   :  { %v1083_v48 = vpop.permute.xlu1 %1082 }
 0xd6f   :  { %v1085_v50 = vmul.f32 %v1083_v48, %v1080_v47  ;;  %1195 = vrot.lane.b32.xlu0 %v2935_v46, %s2610_s6 }
 0xd71   :  { %v2940_v51 = vadd.f32 %v1086_v49, %v1085_v50 }
 0xd73   :  { %1089 = vrot.lane.b32.xlu1 %v2940_v51, %s2610_s6 }
 0xde1   :  { %v1196_v52 = vpop.permute.xlu0 %1195 }
 0xde2   :  { %1199 = vst.msk [vmem:[#allocation13 + $0x6] sm:$0x3] %vm104_vm1, %v1196_v52  ;;  %2155 = vmatmul.mubr.msk.f32.vlgmr.msra.gmra.mrb[10].mxu1 %vm127_vm2, %v1196_v52 }
 0xde3   :  { %2281 = vmatpush3.bf16.msra.mxu1 %v2742_v5  ;;  %2176 = vmatprep.mubr.msk.f32.mxu1 %vm2607_vm0, %v2608_v1 }
 0xde4   :  { %2282 = vmatprep.subr.bf16.mxu1 %v2606_v0 }
 0xde5   :  { %v1090_v53 = vpop.permute.xlu1 %1089 }
 0xde6   :  { %1093 = vst.msk [vmem:[#allocation12 + $0x8] sm:$0x3] %vm104_vm1, %v1090_v53  ;;  %2144 = vmatmul.mubr.msk.f32.vlgmr.msra.gmra.mrb[10].mxu0 %vm127_vm2, %v1090_v53 }
 0xde7   :  { %2275 = vmatpush3.bf16.msra.mxu0 %v2744_v9  ;;  %2284 = vmatpush3.bf16.msra.mxu1 %v2750_v13 }
 0xde8   :  { %2276 = vmatprep.subr.bf16.mxu0 %v2606_v0  ;;  %2165 = vmatprep.mubr.msk.f32.mxu0 %vm2607_vm0, %v2608_v1 }
 0xde9   :  { %2291 = vmatprep.subr.bf16.mxu1 %v2606_v0 }
 0xdeb   :  { %2278 = vmatpush3.bf16.msra.mxu0 %v2758_v15 }
 0xdec   :  { %2285 = vmatprep.subr.bf16.mxu0 %v2606_v0 }
 0xeb5   :  { %v1376_v54 = vpop.f32.mrb[10].mxu1 }
 0xeb6   :  { %v1377_v55 = vadd.f32 %v2783_v18, %v1376_v54  ;;  %v2156_v56 = vpop.f32.mrb[11].mxu1 }
 0xeb8   :  { %1388 = vrot.lane.b32.xlu0 %v1377_v55, %s2609_s20  ;;  %v1380_v61 = vadd.f32 %v1377_v55, %v1307_v60 }
 0xeb9   :  { %v1270_v57 = vpop.f32.mrb[10].mxu0 }
 0xeba   :  { %v1271_v58 = vadd.f32 %v2788_v20, %v1270_v57  ;;  %v2145_v59 = vpop.f32.mrb[11].mxu0  ;;  %v1936_v63 = vmul.f32 -1.442695, %v1380_v61 }
 0xebc   :  { %1282 = vrot.lane.b32.xlu1 %v1271_v58, %s2609_s20  ;;  %v1274_v2 = vadd.f32 %v1271_v58, %v1201_v62  ;;  %2374 = vpow2.f32 %v1936_v63 }
 0xebe   :  { %v1934_v3 = vmul.f32 -1.442695, %v1274_v2 }
 0xec0   :  { %2376 = vpow2.f32 %v1934_v3 }
 0xec6   :  { %v2375_v4 = vpop.eup %2374 }
 0xec7   :  { %v1384_v6 = vadd.f32 1.0, %v2375_v4 }
 0xec9   :  { %2378 = vrcp.f32 %v1384_v6 }
 0xeca   :  { %v2377_v7 = vpop.eup %2376 }
 0xecb   :  { %v1278_v8 = vadd.f32 1.0, %v2377_v7 }
 0xecd   :  { %2380 = vrcp.f32 %v1278_v8 }
 0xed3   :  { %v2379_v10 = vpop.eup %2378 }
 0xed4   :  { %v1398_v26 = vsub.f32 1.0, %v2379_v10  ;;  %v1404_v28 = vmul.f32 %v2379_v10, %v2935_v46 }
 0xed7   :  { %v2381_v14 = vpop.eup %2380 }
 0xed8   :  { %v1292_v31 = vsub.f32 1.0, %v2381_v14  ;;  %v1298_v33 = vmul.f32 %v2381_v14, %v2940_v51 }
 0xf2a   :  { %v1389_v11 = vpop.permute.xlu0 %1388 }
 0xf2b   :  { %v1391_v12 = vmul.f32 %v2379_v10, %v1389_v11 }
 0xf2d   :  { %1393 = vrot.lane.b32.xlu0 %v1391_v12, %s2609_s20 }
 0xf2e   :  { %v1283_v16 = vpop.permute.xlu1 %1282 }
 0xf2f   :  { %v1285_v17 = vmul.f32 %v2381_v14, %v1283_v16 }
 0xf31   :  { %1287 = vrot.lane.b32.xlu1 %v1285_v17, %s2609_s20 }
 0xf9f   :  { %v1394_v19 = vpop.permute.xlu0 %1393 }
 0xfa0   :  { %v1396_v21 = vadd.f32 %v1394_v19, %v1307_v60 }
 0xfa2   :  { %2382 = vtanh.f32 %v1396_v21 }
 0xfa3   :  { %v1288_v22 = vpop.permute.xlu1 %1287 }
 0xfa4   :  { %v1290_v23 = vadd.f32 %v1288_v22, %v1201_v62  ;;  %v1730_v22 = vld [vmem:[#allocation7] sm:$0x3] }
 0xfa6   :  { %2384 = vtanh.f32 %v1290_v23 }
 0xfac   :  { %v2383_v24 = vpop.eup %2382 }
 0xfad   :  { %1400 = vrot.lane.b32.xlu0 %v2383_v24, %s2610_s6  ;;  %v1625_v24 = vld [vmem:[#allocation4 + $0xe] sm:$0x3] }
 0xfb0   :  { %v2385_v25 = vpop.eup %2384 }
 0xfb1   :  { %1294 = vrot.lane.b32.xlu1 %v2385_v25, %s2610_s6 }
0x101f   :  { %v1401_v27 = vpop.permute.xlu0 %1400 }
0x1020   :  { %v1403_v29 = vmul.f32 %v1401_v27, %v1398_v26 }
0x1022   :  { %v2969_v30 = vadd.f32 %v1404_v28, %v1403_v29 }
0x1023   :  { %v1295_v32 = vpop.permute.xlu1 %1294 }
0x1024   :  { %v1297_v34 = vmul.f32 %v1295_v32, %v1292_v31  ;;  %1407 = vrot.lane.b32.xlu0 %v2969_v30, %s2610_s6 }
0x1026   :  { %v2974_v35 = vadd.f32 %v1298_v33, %v1297_v34 }
0x1028   :  { %1301 = vrot.lane.b32.xlu1 %v2974_v35, %s2610_s6 }
0x1096   :  { %v1408_v36 = vpop.permute.xlu0 %1407 }
0x1097   :  { %1411 = vst.msk [vmem:[#allocation13 + $0x4] sm:$0x3] %vm104_vm1, %v1408_v36  ;;  %2177 = vmatmul.mubr.msk.f32.vlgmr.msra.gmra.mrb[12].mxu1 %vm127_vm2, %v1408_v36 }
0x1098   :  { %2293 = vmatpush3.bf16.msra.mxu1 %v2742_v5  ;;  %2198 = vmatprep.mubr.msk.f32.mxu1 %vm2607_vm0, %v2608_v1 }
0x1099   :  { %2294 = vmatprep.subr.bf16.mxu1 %v2606_v0 }
0x109a   :  { %v1302_v37 = vpop.permute.xlu1 %1301 }
0x109b   :  { %1305 = vst.msk [vmem:[#allocation12 + $0xa] sm:$0x3] %vm104_vm1, %v1302_v37  ;;  %2166 = vmatmul.mubr.msk.f32.vlgmr.msra.gmra.mrb[12].mxu0 %vm127_vm2, %v1302_v37 }
0x109c   :  { %2287 = vmatpush3.bf16.msra.mxu0 %v2744_v9  ;;  %2296 = vmatpush3.bf16.msra.mxu1 %v2750_v13  ;;  %v1519_v9 = vld [vmem:[#allocation7 + $0x2] sm:$0x3] }
0x109d   :  { %2288 = vmatprep.subr.bf16.mxu0 %v2606_v0  ;;  %2187 = vmatprep.mubr.msk.f32.mxu0 %vm2607_vm0, %v2608_v1  ;;  %v1413_v0 = vld [vmem:[#allocation4 + $0xc] sm:$0x3] }
0x10a0   :  { %2290 = vmatpush3.bf16.msra.mxu0 %v2758_v15 }
0x116a   :  { %v1588_v5 = vpop.f32.mrb[12].mxu1 }
0x116b   :  { %v1589_v38 = vadd.f32 %v2783_v18, %v1588_v5  ;;  %v2178_v39 = vpop.f32.mrb[13].mxu1 }
0x116d   :  { %1600 = vrot.lane.b32.xlu0 %v1589_v38, %s2609_s20  ;;  %v1592_v13 = vadd.f32 %v1589_v38, %v1519_v9 }
0x116e   :  { %v1482_v40 = vpop.f32.mrb[12].mxu0 }
0x116f   :  { %v1483_v41 = vadd.f32 %v2788_v20, %v1482_v40  ;;  %v2167_v42 = vpop.f32.mrb[13].mxu0  ;;  %v1940_v43 = vmul.f32 -1.442695, %v1592_v13 }
0x1171   :  { %1494 = vrot.lane.b32.xlu1 %v1483_v41, %s2609_s20  ;;  %v1486_v44 = vadd.f32 %v1483_v41, %v1413_v0  ;;  %2386 = vpow2.f32 %v1940_v43 }
0x1173   :  { %v1938_v1 = vmul.f32 -1.442695, %v1486_v44 }
0x1175   :  { %2388 = vpow2.f32 %v1938_v1 }
0x117b   :  { %v2387_v15 = vpop.eup %2386 }
0x117c   :  { %v1596_v45 = vadd.f32 1.0, %v2387_v15 }
0x117e   :  { %2390 = vrcp.f32 %v1596_v45 }
0x117f   :  { %v2389_v46 = vpop.eup %2388 }
0x1180   :  { %v1490_v47 = vadd.f32 1.0, %v2389_v46 }
0x1182   :  { %2392 = vrcp.f32 %v1490_v47 }
0x1188   :  { %v2391_v48 = vpop.eup %2390 }
0x1189   :  { %v1610_v60 = vsub.f32 1.0, %v2391_v48  ;;  %v1616_v62 = vmul.f32 %v2391_v48, %v2969_v30 }
0x118c   :  { %v2393_v51 = vpop.eup %2392 }
0x118d   :  { %v1504_v3 = vsub.f32 1.0, %v2393_v51  ;;  %v1510_v6 = vmul.f32 %v2393_v51, %v2974_v35 }
0x11df   :  { %v1601_v49 = vpop.permute.xlu0 %1600 }
0x11e0   :  { %v1603_v50 = vmul.f32 %v2391_v48, %v1601_v49 }
0x11e2   :  { %1605 = vrot.lane.b32.xlu0 %v1603_v50, %s2609_s20 }
0x11e3   :  { %v1495_v52 = vpop.permute.xlu1 %1494 }
0x11e4   :  { %v1497_v53 = vmul.f32 %v2393_v51, %v1495_v52 }
0x11e6   :  { %1499 = vrot.lane.b32.xlu1 %v1497_v53, %s2609_s20 }
0x1254   :  { %v1606_v54 = vpop.permute.xlu0 %1605 }
0x1255   :  { %v1608_v55 = vadd.f32 %v1606_v54, %v1519_v9 }
0x1257   :  { %2394 = vtanh.f32 %v1608_v55 }
0x1258   :  { %v1500_v56 = vpop.permute.xlu1 %1499 }
0x1259   :  { %v1502_v57 = vadd.f32 %v1500_v56, %v1413_v0 }
0x125b   :  { %2396 = vtanh.f32 %v1502_v57 }
0x1261   :  { %v2395_v58 = vpop.eup %2394 }
0x1262   :  { %1612 = vrot.lane.b32.xlu0 %v2395_v58, %s2610_s6 }
0x1265   :  { %v2397_v59 = vpop.eup %2396 }
0x1266   :  { %1506 = vrot.lane.b32.xlu1 %v2397_v59, %s2610_s6 }
0x12d4   :  { %v1613_v61 = vpop.permute.xlu0 %1612 }
0x12d5   :  { %v1615_v63 = vmul.f32 %v1613_v61, %v1610_v60 }
0x12d7   :  { %v1617_v2 = vadd.f32 %v1616_v62, %v1615_v63 }
0x12d8   :  { %v1507_v4 = vpop.permute.xlu1 %1506 }
0x12d9   :  { %v1509_v7 = vmul.f32 %v1507_v4, %v1504_v3  ;;  %1619 = vrot.lane.b32.xlu0 %v1617_v2, %s2610_s6 }
0x12db   :  { %v1511_v8 = vadd.f32 %v1510_v6, %v1509_v7 }
0x12dd   :  { %1513 = vrot.lane.b32.xlu1 %v1511_v8, %s2610_s6 }
0x134b   :  { %v1620_v10 = vpop.permute.xlu0 %1619 }
0x134c   :  { %1623 = vst.msk [vmem:[#allocation13 + $0x2] sm:$0x3] %vm104_vm1, %v1620_v10  ;;  %2199 = vmatmul.mubr.msk.f32.vlgmr.msra.gmra.mrb[14].mxu1 %vm127_vm2, %v1620_v10 }
0x134f   :  { %v1514_v11 = vpop.permute.xlu1 %1513 }
0x1350   :  { %1517 = vst.msk [vmem:[#allocation12 + $0xc] sm:$0x3] %vm104_vm1, %v1514_v11  ;;  %2188 = vmatmul.mubr.msk.f32.vlgmr.msra.gmra.mrb[14].mxu0 %vm127_vm2, %v1514_v11 }
0x141f   :  { %v1799_v12 = vpop.f32.mrb[14].mxu1 }
0x1420   :  { %v1800_v14 = vadd.f32 %v2783_v18, %v1799_v12  ;;  %v2200_v16 = vpop.f32.mrb[15].mxu1 }
0x1422   :  { %1811 = vrot.lane.b32.xlu0 %v1800_v14, %s2609_s20  ;;  %v1803_v23 = vadd.f32 %v1800_v14, %v1730_v22 }
0x1423   :  { %v1694_v17 = vpop.f32.mrb[14].mxu0 }
0x1424   :  { %v1695_v19 = vadd.f32 %v2788_v20, %v1694_v17  ;;  %v2189_v21 = vpop.f32.mrb[15].mxu0  ;;  %v1944_v25 = vmul.f32 -1.442695, %v1803_v23 }
0x1426   :  { %1706 = vrot.lane.b32.xlu1 %v1695_v19, %s2609_s20  ;;  %v1698_v26 = vadd.f32 %v1695_v19, %v1625_v24  ;;  %2398 = vpow2.f32 %v1944_v25 }
0x1428   :  { %v1942_v27 = vmul.f32 -1.442695, %v1698_v26 }
0x142a   :  { %2400 = vpow2.f32 %v1942_v27 }
0x1430   :  { %v2399_v28 = vpop.eup %2398 }
0x1431   :  { %v1807_v29 = vadd.f32 1.0, %v2399_v28 }
0x1433   :  { %2402 = vrcp.f32 %v1807_v29 }
0x1434   :  { %v2401_v18 = vpop.eup %2400 }
0x1435   :  { %v1702_v30 = vadd.f32 1.0, %v2401_v18 }
0x1437   :  { %2404 = vrcp.f32 %v1702_v30 }
0x143d   :  { %v2403_v31 = vpop.eup %2402 }
0x143e   :  { %v1821_v41 = vsub.f32 1.0, %v2403_v31  ;;  %v1827_v9 = vmul.f32 %v2403_v31, %v1617_v2 }
0x1441   :  { %v2405_v33 = vpop.eup %2404 }
0x1442   :  { %v1716_v43 = vsub.f32 1.0, %v2405_v33  ;;  %v1722_v1 = vmul.f32 %v2405_v33, %v1511_v8 }
0x1494   :  { %v1812_v32 = vpop.permute.xlu0 %1811 }
0x1495   :  { %v1814_v20 = vmul.f32 %v2403_v31, %v1812_v32 }
0x1497   :  { %1816 = vrot.lane.b32.xlu0 %v1814_v20, %s2609_s20 }
0x1498   :  { %v1707_v34 = vpop.permute.xlu1 %1706 }
0x1499   :  { %v1709_v35 = vmul.f32 %v2405_v33, %v1707_v34 }
0x149b   :  { %1711 = vrot.lane.b32.xlu1 %v1709_v35, %s2609_s20 }
0x1509   :  { %v1817_v36 = vpop.permute.xlu0 %1816 }
0x150a   :  { %v1819_v37 = vadd.f32 %v1817_v36, %v1730_v22 }
0x150c   :  { %2406 = vtanh.f32 %v1819_v37 }
0x150d   :  { %v1712_v5 = vpop.permute.xlu1 %1711 }
0x150e   :  { %v1714_v38 = vadd.f32 %v1712_v5, %v1625_v24 }
0x1510   :  { %2408 = vtanh.f32 %v1714_v38 }
0x1516   :  { %v2407_v39 = vpop.eup %2406 }
0x1517   :  { %1823 = vrot.lane.b32.xlu0 %v2407_v39, %s2610_s6 }
0x151a   :  { %v2409_v40 = vpop.eup %2408 }
0x151b   :  { %1718 = vrot.lane.b32.xlu1 %v2409_v40, %s2610_s6 }
0x1589   :  { %v1824_v42 = vpop.permute.xlu0 %1823 }
0x158a   :  { %v1826_v13 = vmul.f32 %v1824_v42, %v1821_v41 }
0x158c   :  { %v1828_v0 = vadd.f32 %v1827_v9, %v1826_v13 }
0x158d   :  { %v1719_v44 = vpop.permute.xlu1 %1718 }
0x158e   :  { %v1721_v15 = vmul.f32 %v1719_v44, %v1716_v43  ;;  %1830 = vrot.lane.b32.xlu0 %v1828_v0, %s2610_s6 }
0x1590   :  { %v1723_v45 = vadd.f32 %v1722_v1, %v1721_v15 }
0x1592   :  { %1725 = vrot.lane.b32.xlu1 %v1723_v45, %s2610_s6 }
0x1600   :  { %v1831_v46 = vpop.permute.xlu0 %1830 }
0x1601   :  { %1833 = vst.msk [vmem:[#allocation13] sm:$0x3] %vm104_vm1, %v1831_v46  ;;  %1835 = vst.msk [vmem:[#allocation3] sm:$0x3] %vm104_vm1, %v1831_v46 }
0x1602   :  { %1840 = vst.msk [vmem:[#allocation16] sm:$0x3] %vm104_vm1, %v1831_v46 }
0x1603   :  { %2509 = shalt.err (!%p2506_p8)
}
0x1604   :  { %s2510_s28 = scalar_lea.hbm %s3108_s9, 256 }
0x1605   :  { %p2511_p9 = scmp.ne.s32.totalorder %s3108_s9, %s2510_s28  ;;  %p2514_p10 = scmp.lt.u32.totalorder %s2510_s28, %s3108_s9 }
0x1607   :  { %p2516_p11 = pnand %p2514_p10, %p2511_p9 }
0x1609   :  { %2519 = shalt.err (!%p2516_p11)
}
0x160a   :  { %1868 = dma.vmem_to_hbm [thread:$0]  %s1863_s17, 256, %s3108_s9, [#allocation14], %s2600_s29, %s2600_s29, %s2601_s30  }
0x160b   :  { %s2520_s15 = scalar_lea.vmem %s3018_s21, 32  ;;  %p2525_p13 = scmp.lt.s32.totalorder %s3018_s21, %s3018_s21 }
0x160c   :  { %p2521_p12 = scmp.ne.s32.totalorder %s3018_s21, %s2520_s15  ;;  %p2526_p0 = scmp.lt.s32.totalorder %s2520_s15, %s2520_s15 }
0x160e   :  { %p2527_p1 = por %p2526_p0, %p2525_p13 }
0x1610   :  { %p2528_p2 = pnand %p2527_p1, %p2521_p12 }
0x1612   :  { %2531 = shalt.err (!%p2528_p2)
}
0x1613   :  { %s2532_s16 = scalar_lea.hbm %s3110_s11, 32 }
0x1614   :  { %p2533_p3 = scmp.ne.s32.totalorder %s3110_s11, %s2532_s16  ;;  %p2536_p4 = scmp.lt.u32.totalorder %s2532_s16, %s3110_s11 }
0x1616   :  { %p2538_p5 = pnand %p2536_p4, %p2533_p3 }
0x1618   :  { %2541 = shalt.err (!%p2538_p5)
}
0x1619   :  { %1888 = dma.vmem_to_hbm [thread:$0]  %s3018_s21, 32, %s3110_s11, [#allocation17]   ;;  %v1726_v47 = vpop.permute.xlu1 %1725 }
0x161a   :  { %1729 = vst.msk [vmem:[#allocation12 + $0xe] sm:$0x3] %vm104_vm1, %v1726_v47  ;;  %1834 = vst.msk [vmem:[#allocation2] sm:$0x3] %vm104_vm1, %v1726_v47  ;;  %s2542_s19 = scalar_lea.vmem %s3023_s23, 256  ;;  %p2547_p7 = scmp.lt.s32.totalorder %s3023_s23, %s3023_s23 }
0x161b   :  { %1839 = vst.msk [vmem:[#allocation15] sm:$0x3] %vm104_vm1, %v1726_v47  ;;  %p2543_p6 = scmp.ne.s32.totalorder %s3023_s23, %s2542_s19  ;;  %p2548_p8 = scmp.lt.s32.totalorder %s2542_s19, %s2542_s19 }
0x161d   :  { %p2549_p9 = por %p2548_p8, %p2547_p7 }
0x161f   :  { %p2550_p10 = pnand %p2549_p9, %p2543_p6 }
0x1621   :  { %2553 = shalt.err (!%p2550_p10)
}
0x1622   :  { %s2554_s11 = scalar_lea.hbm %s3107_s8, 256 }
0x1623   :  { %p2555_p11 = scmp.ne.s32.totalorder %s3107_s8, %s2554_s11  ;;  %p2558_p12 = scmp.lt.u32.totalorder %s2554_s11, %s3107_s8 }
0x1625   :  { %p2560_p13 = pnand %p2558_p12, %p2555_p11 }
0x1627   :  { %2563 = shalt.err (!%p2560_p13)
}
0x1628   :  { %1852 = dma.vmem_to_hbm [thread:$0]  %s3023_s23, 256, %s3107_s8, [#allocation6], %s2600_s29, %s2600_s29, %s2601_s30  }
0x1629   :  { %s2564_s4 = scalar_lea.vmem %s3057_s18, 32  ;;  %p2569_p1 = scmp.lt.s32.totalorder %s3057_s18, %s3057_s18 }
0x162a   :  { %p2565_p0 = scmp.ne.s32.totalorder %s3057_s18, %s2564_s4  ;;  %p2570_p2 = scmp.lt.s32.totalorder %s2564_s4, %s2564_s4 }
0x162c   :  { %p2571_p3 = por %p2570_p2, %p2569_p1 }
0x162e   :  { %p2572_p4 = pnand %p2571_p3, %p2565_p0 }
0x1630   :  { %2575 = shalt.err (!%p2572_p4)
}
0x1631   :  { %s2576_s13 = scalar_lea.hbm %s3109_s10, 32 }
0x1632   :  { %p2577_p5 = scmp.ne.s32.totalorder %s3109_s10, %s2576_s13  ;;  %p2580_p6 = scmp.lt.u32.totalorder %s2576_s13, %s3109_s10 }
0x1634   :  { %p2582_p7 = pnand %p2580_p6, %p2577_p5 }
0x1636   :  { %2585 = shalt.err (!%p2582_p7)
}
0x1637   :  { %1878 = dma.vmem_to_hbm [thread:$0]  %s3057_s18, 32, %s3109_s10, [#allocation14]  }
0x1638   :  { %2592 = dma.done.wait [#allocation6], 256  }
0x1639   :  { %2593 = vsyncadd [#allocation6], 4294967040 }
0x163a   :  { %2594 = dma.done.wait [#allocation14], 288  }
0x163b   :  { %2595 = vsyncadd [#allocation14], 4294967008 }
0x163c   :  { %2596 = dma.done.wait [#allocation17], 32  }
0x163d   :  { %2597 = vsyncadd [#allocation17], 4294967264 }
0x163e   :  { %1901 = vsyncpa [#allocation5], 1 }
0x163f   :  { %1902 = vsyncpa [#allocation8], 1 }
0x1640   :  { %1903 = vsyncpa [#allocation11], 1 }
0x1641   :  { %1904 = vsyncpa [#allocation6], 1 }
0x1642   :  { %1905 = vsyncpa [#allocation14], 1 }
0x1643   :  { %1906 = vsyncpa [#allocation17], 1 }

</bundles_post_ra>
